<compile_context>
chip_gen: v6e
topology: v6e:2x2x1
jax: 0.10.0
libtpu: 0.0.40
codegen_flags: <defaults>
</compile_context>

<pallas_src>
import functools

import jax
import jax.numpy as jnp
from jax import lax
from jax.experimental import pallas as pl
from jax.experimental.pallas import tpu as pltpu


def _round_up(v, m):
    return (v + m - 1) // m * m


def _prenet_kernel(lens_ref, x_ref, wc_ref, bc_ref, g_ref, be_ref, wo_ref,
                   bo_ref, o_ref, *, num_layers, kernel_size, h_real, eps,
                   mm_dtype):
    """One batch element. x_ref/o_ref: (Np, P); weights fully resident."""
    b = pl.program_id(0)
    length = lens_ref[b]                      # scalar sequence length (SMEM)

    x0 = x_ref[...]                           # (Np, P) f32, padded chans/rows = 0
    n, p = x0.shape
    pad = (kernel_size - 1) // 2              # odd kernel -> symmetric 'same'

    # Sequence mask rebuilt in-kernel from the prefetched length.
    row = lax.broadcasted_iota(jnp.int32, (n, 1), 0)
    seq_mask = (row < length).astype(jnp.float32)             # (Np, 1)

    # Channel-validity mask so LayerNorm stats use only the real H channels.
    if h_real != p:
        ch_mask = (lax.broadcasted_iota(jnp.int32, (1, p), 1)
                   < h_real).astype(jnp.float32)               # (1, P)
    else:
        ch_mask = None
    inv_h = 1.0 / float(h_real)

    x = x0
    for layer in range(num_layers):
        xm = x * seq_mask                                      # (Np, P) f32
        # im2col: K shifted copies (sublane roll + edge mask), concat on lanes.
        cols = []
        for k in range(kernel_size):
            s = pad - k                       # shifted[i] = xm[i + k - pad]
            shifted = pltpu.roll(xm, s % n, 0) if (s % n) else xm
            valid = (row >= s) & (row < n + s)                 # rows inside [0, Np)
            cols.append(jnp.where(valid, shifted, 0.0))
        win = jnp.concatenate(cols, axis=1).astype(mm_dtype)   # (Np, K*P)

        # Conv1d (cross-correlation, like torch.nn.Conv1d) as a single matmul.
        acc = jnp.dot(win, wc_ref[layer],
                      preferred_element_type=jnp.float32) + bc_ref[layer]

        # ConvLayerNorm over channels (padded channels of acc are exactly 0).
        mean = jnp.sum(acc, axis=-1, keepdims=True) * inv_h
        cen = acc - mean
        if ch_mask is not None:
            cen = cen * ch_mask
        var = jnp.sum(cen * cen, axis=-1, keepdims=True) * inv_h
        xh = cen * lax.rsqrt(var + eps)
        x = jnp.maximum(xh * g_ref[layer] + be_ref[layer], 0.0)
        # TODO(synk): dropout is identity at inference time; not implemented.

    # out_ff (1x1 conv) + residual (unmasked input), then final mask.
    out = jnp.dot(x.astype(mm_dtype), wo_ref[...],
                  preferred_element_type=jnp.float32) + bo_ref[...]
    o_ref[...] = ((out + x0) * seq_mask).astype(o_ref.dtype)


def tts_encoder_prenet_forward(embedding, encoder_mask, params, *,
                               num_layers, kernel_size, eps=1e-5,
                               mm_dtype=jnp.bfloat16):
    """embedding: [B, E, N], encoder_mask: [B, 1, N] -> [B, D, N] (PyTorch NCL).

    NOTE: encoder_mask is assumed to be a contiguous prefix (length) mask, which
    is what the TTS encoder produces; the per-batch lengths are scalar-prefetched
    and the mask is rebuilt inside the kernel.
    """
    wconv, bconv, gamma, beta, wout, bout = params
    B, E, N = embedding.shape
    L, K, Cin, H = wconv.shape
    D = wout.shape[-1]
    assert E == H == D, "residual path requires input == hidden == output dims"
    assert Cin == E and L == num_layers and K == kernel_size

    P = _round_up(E, 128)        # lane-dense channel layout
    Np = _round_up(N, 8)         # sublane-aligned time axis

    # [B, E, N] -> [B, Np, P] channels-last, zero-padded channels / time rows.
    x = jnp.transpose(embedding, (0, 2, 1)).astype(jnp.float32)
    x = jnp.pad(x, ((0, 0), (0, Np - N), (0, P - E)))

    # Per-batch lengths (int32) for scalar prefetch — no broadcast mask in HBM.
    lens = jnp.sum(encoder_mask > 0.5, axis=(1, 2)).astype(jnp.int32)   # [B]

    # Conv weights -> im2col layout (L, K*P, P); matmul inputs in mm_dtype.
    wc = jnp.pad(wconv, ((0, 0), (0, 0), (0, P - E), (0, P - H)))
    wc = wc.reshape(L, K * P, P).astype(mm_dtype)
    bc = jnp.pad(bconv.reshape(L, 1, H), ((0, 0), (0, 0), (0, P - H))
                 ).astype(jnp.float32)
    g = jnp.pad(gamma.reshape(L, 1, H), ((0, 0), (0, 0), (0, P - H))
                ).astype(jnp.float32)
    be = jnp.pad(beta.reshape(L, 1, H), ((0, 0), (0, 0), (0, P - H))
                 ).astype(jnp.float32)
    wo = jnp.pad(wout, ((0, P - H), (0, P - D))).astype(mm_dtype)
    bo = jnp.pad(bout.reshape(1, D), ((0, 0), (0, P - D))).astype(jnp.float32)

    kernel = functools.partial(_prenet_kernel, num_layers=L, kernel_size=K,
                               h_real=H, eps=eps, mm_dtype=mm_dtype)

    out = pl.pallas_call(
        kernel,
        out_shape=jax.ShapeDtypeStruct((B, Np, P), jnp.float32),
        grid_spec=pltpu.PrefetchScalarGridSpec(
            num_scalar_prefetch=1,
            grid=(B,),
            in_specs=[
                pl.BlockSpec((pl.Squeezed(), Np, P), lambda b, lens: (b, 0, 0)),
                pl.BlockSpec((L, K * P, P), lambda b, lens: (0, 0, 0)),
                pl.BlockSpec((L, 1, P), lambda b, lens: (0, 0, 0)),
                pl.BlockSpec((L, 1, P), lambda b, lens: (0, 0, 0)),
                pl.BlockSpec((L, 1, P), lambda b, lens: (0, 0, 0)),
                pl.BlockSpec((P, P), lambda b, lens: (0, 0)),
                pl.BlockSpec((1, P), lambda b, lens: (0, 0)),
            ],
            out_specs=pl.BlockSpec((pl.Squeezed(), Np, P),
                                   lambda b, lens: (b, 0, 0)),
        ),
        compiler_params=pltpu.CompilerParams(
            dimension_semantics=("parallel",)),
    )(lens, x, wc, bc, g, be, wo, bo)

    out = out[:, :N, :D]
    return jnp.transpose(out, (0, 2, 1))                        # [B, D, N]


def reference_forward(embedding, encoder_mask, params, eps=1e-5):
    """Pure-JAX reference mirroring the PyTorch forward (NCL layout)."""
    wconv, bconv, gamma, beta, wout, bout = params
    L = wconv.shape[0]
    x_res = embedding
    x = embedding
    for l in range(L):
        xm = x * encoder_mask
        w = jnp.transpose(wconv[l], (2, 1, 0))   # (H, C_in, K)
        y = lax.conv_general_dilated(xm, w, (1,), 'SAME',
                                     dimension_numbers=('NCH', 'OIH', 'NCH'))
        y = y + bconv[l].reshape(1, -1, 1)
        yt = jnp.transpose(y, (0, 2, 1))         # [B, N, H]
        mean = jnp.mean(yt, -1, keepdims=True)
        var = jnp.mean(jnp.square(yt - mean), -1, keepdims=True)
        yt = (yt - mean) * lax.rsqrt(var + eps)
        yt = yt * gamma[l].reshape(1, 1, -1) + beta[l].reshape(1, 1, -1)
        x = jnp.transpose(jnp.maximum(yt, 0.0), (0, 2, 1))
    out = jnp.einsum('hd,bhn->bdn', wout, x) + bout.reshape(1, -1, 1)
    out = (out + x_res) * encoder_mask
    return out


if __name__ == "__main__":
    # residual add in the module requires input_embedding_size == hidden == output
    B, N = 2, 20
    E = H = D = 48          # deliberately not a multiple of 128: exercises padding
    K, L = 5, 3

    key = jax.random.PRNGKey(0)
    k1, k2, k3, k4, k5 = jax.random.split(key, 5)

    bound = 1.0 / (E * K) ** 0.5  # PyTorch Conv1d default init scale
    wconv = jax.random.uniform(k1, (L, K, E, H), jnp.float32, -bound, bound)
    bconv = jax.random.uniform(k2, (L, H), jnp.float32, -bound, bound)
    gamma = jnp.ones((L, H), jnp.float32)        # ConvLayerNorm scale
    beta = jnp.zeros((L, H), jnp.float32)        # ConvLayerNorm shift
    # NOTE: the PyTorch module zero-inits out_ff; nonzero values are used so the
    # whole fused pipeline is numerically exercised.
    wout = 0.05 * jax.random.normal(k3, (H, D), jnp.float32)
    bout = 0.05 * jax.random.normal(k4, (D,), jnp.float32)
    params = (wconv, bconv, gamma, beta, wout, bout)

    embedding = jax.random.normal(k5, (B, E, N), jnp.float32)            # [B, E, N]
    lens = jnp.array([N, 13], jnp.int32)
    encoder_mask = (jnp.arange(N)[None, None, :] <
                    lens[:, None, None]).astype(jnp.float32)             # [B, 1, N]

    ref = reference_forward(embedding, encoder_mask, params)

    # Exact-semantics check (f32 matmul inputs).
    out_f32 = tts_encoder_prenet_forward(embedding, encoder_mask, params,
                                         num_layers=L, kernel_size=K,
                                         mm_dtype=jnp.float32)
    out_f32 = jax.block_until_ready(out_f32)
    assert out_f32.shape == (B, D, N), out_f32.shape
    err32 = float(jnp.max(jnp.abs(out_f32 - ref)))
    assert err32 < 2e-4, f"f32 path max err {err32}"

    # Fast path: bf16 MXU inputs, f32 accumulation + f32 LN/ReLU/mask math.
    out_bf16 = tts_encoder_prenet_forward(embedding, encoder_mask, params,
                                          num_layers=L, kernel_size=K,
                                          mm_dtype=jnp.bfloat16)
    out_bf16 = jax.block_until_ready(out_bf16)
    errbf = float(jnp.max(jnp.abs(out_bf16 - ref)))
    assert errbf < 5e-2, f"bf16 path max err {errbf}"

    print("KERNEL_OK")
</pallas_src>

<mosaic_0001>
module attributes {stable_mosaic.version = 11 : i64} {
  func.func @_prenet_kernel(%arg0: i32, %arg1: memref<2xi32, #tpu.memory_space<smem>>, %arg2: memref<1x24x128xf32, #tpu.memory_space<vmem>>, %arg3: memref<3x640x128xf32, #tpu.memory_space<vmem>>, %arg4: memref<3x1x128xf32, #tpu.memory_space<vmem>>, %arg5: memref<3x1x128xf32, #tpu.memory_space<vmem>>, %arg6: memref<3x1x128xf32, #tpu.memory_space<vmem>>, %arg7: memref<128x128xf32, #tpu.memory_space<vmem>>, %arg8: memref<1x128xf32, #tpu.memory_space<vmem>>, %arg9: memref<1x24x128xf32, #tpu.memory_space<vmem>>) attributes {dimension_semantics = [#tpu.dimension_semantics<parallel>], iteration_bounds = array<i64: 2>, scalar_prefetch = 1 : i64, scratch_operands = 0 : i64, tpu.core_type = #tpu.core_type<tc>, window_params = [{transform_indices = @transform_0, window_bounds = array<i64: 1, 24, 128>}, {pipeline_mode = #tpu.pipeline_mode<synchronous>, transform_indices = @transform_1, window_bounds = array<i64: 3, 640, 128>}, {pipeline_mode = #tpu.pipeline_mode<synchronous>, transform_indices = @transform_2, window_bounds = array<i64: 3, 1, 128>}, {pipeline_mode = #tpu.pipeline_mode<synchronous>, transform_indices = @transform_3, window_bounds = array<i64: 3, 1, 128>}, {pipeline_mode = #tpu.pipeline_mode<synchronous>, transform_indices = @transform_4, window_bounds = array<i64: 3, 1, 128>}, {pipeline_mode = #tpu.pipeline_mode<synchronous>, transform_indices = @transform_5, window_bounds = array<i64: 128, 128>}, {pipeline_mode = #tpu.pipeline_mode<synchronous>, transform_indices = @transform_6, window_bounds = array<i64: 1, 128>}, {transform_indices = @transform_7, window_bounds = array<i64: 1, 24, 128>}]} {
    %0 = arith.index_cast %arg0 : i32 to index
    %1 = memref.load %arg1[%0] : memref<2xi32, #tpu.memory_space<smem>>
    %c0 = arith.constant 0 : index
    %c0_0 = arith.constant 0 : index
    %c0_1 = arith.constant 0 : index
    %2 = vector.load %arg2[%c0, %c0_0, %c0_1] : memref<1x24x128xf32, #tpu.memory_space<vmem>>, vector<1x24x128xf32>
    %3 = vector.shape_cast %2 : vector<1x24x128xf32> to vector<24x128xf32>
    %4 = tpu.iota {dimensions = array<i32: 0>} : vector<24x1xi32>
    %5 = vector.broadcast %1 : i32 to vector<24x1xi32>
    %6 = arith.cmpi slt, %4, %5 : vector<24x1xi32>
    %7 = arith.extui %6 : vector<24x1xi1> to vector<24x1xi32>
    %8 = arith.sitofp %7 : vector<24x1xi32> to vector<24x1xf32>
    %9 = tpu.iota {dimensions = array<i32: 1>} : vector<1x128xi32>
    %c48_i32 = arith.constant 48 : i32
    %10 = vector.broadcast %c48_i32 : i32 to vector<1x128xi32>
    %11 = arith.cmpi slt, %9, %10 : vector<1x128xi32>
    %12 = arith.extui %11 : vector<1x128xi1> to vector<1x128xi32>
    %13 = arith.sitofp %12 : vector<1x128xi32> to vector<1x128xf32>
    %14 = vector.broadcast %8 : vector<24x1xf32> to vector<24x128xf32>
    %15 = arith.mulf %3, %14 : vector<24x128xf32>
    %c2_i32 = arith.constant 2 : i32
    %16 = tpu.dynamic_rotate %15 by %c2_i32 dim 0 : vector<24x128xf32>, i32 -> vector<24x128xf32>
    %c2_i32_2 = arith.constant 2 : i32
    %17 = vector.broadcast %c2_i32_2 : i32 to vector<24x1xi32>
    %18 = arith.cmpi sge, %4, %17 : vector<24x1xi32>
    %c26_i32 = arith.constant 26 : i32
    %19 = vector.broadcast %c26_i32 : i32 to vector<24x1xi32>
    %20 = arith.cmpi slt, %4, %19 : vector<24x1xi32>
    %21 = arith.andi %18, %20 : vector<24x1xi1>
    %cst = arith.constant 0.000000e+00 : f32
    %22 = vector.shape_cast %21 : vector<24x1xi1> to vector<24x1xi1>
    %23 = vector.broadcast %22 : vector<24x1xi1> to vector<24x128xi1>
    %24 = vector.broadcast %cst : f32 to vector<24x128xf32>
    %25 = arith.select %23, %16, %24 : vector<24x128xi1>, vector<24x128xf32>
    %c1_i32 = arith.constant 1 : i32
    %26 = tpu.dynamic_rotate %15 by %c1_i32 dim 0 : vector<24x128xf32>, i32 -> vector<24x128xf32>
    %c1_i32_3 = arith.constant 1 : i32
    %27 = vector.broadcast %c1_i32_3 : i32 to vector<24x1xi32>
    %28 = arith.cmpi sge, %4, %27 : vector<24x1xi32>
    %c25_i32 = arith.constant 25 : i32
    %29 = vector.broadcast %c25_i32 : i32 to vector<24x1xi32>
    %30 = arith.cmpi slt, %4, %29 : vector<24x1xi32>
    %31 = arith.andi %28, %30 : vector<24x1xi1>
    %cst_4 = arith.constant 0.000000e+00 : f32
    %32 = vector.shape_cast %31 : vector<24x1xi1> to vector<24x1xi1>
    %33 = vector.broadcast %32 : vector<24x1xi1> to vector<24x128xi1>
    %34 = vector.broadcast %cst_4 : f32 to vector<24x128xf32>
    %35 = arith.select %33, %26, %34 : vector<24x128xi1>, vector<24x128xf32>
    %c0_i32 = arith.constant 0 : i32
    %36 = vector.broadcast %c0_i32 : i32 to vector<24x1xi32>
    %37 = arith.cmpi sge, %4, %36 : vector<24x1xi32>
    %c24_i32 = arith.constant 24 : i32
    %38 = vector.broadcast %c24_i32 : i32 to vector<24x1xi32>
    %39 = arith.cmpi slt, %4, %38 : vector<24x1xi32>
    %40 = arith.andi %37, %39 : vector<24x1xi1>
    %cst_5 = arith.constant 0.000000e+00 : f32
    %41 = vector.shape_cast %40 : vector<24x1xi1> to vector<24x1xi1>
    %42 = vector.broadcast %41 : vector<24x1xi1> to vector<24x128xi1>
    %43 = vector.broadcast %cst_5 : f32 to vector<24x128xf32>
    %44 = arith.select %42, %15, %43 : vector<24x128xi1>, vector<24x128xf32>
    %c23_i32 = arith.constant 23 : i32
    %45 = tpu.dynamic_rotate %15 by %c23_i32 dim 0 : vector<24x128xf32>, i32 -> vector<24x128xf32>
    %c-1_i32 = arith.constant -1 : i32
    %46 = vector.broadcast %c-1_i32 : i32 to vector<24x1xi32>
    %47 = arith.cmpi sge, %4, %46 : vector<24x1xi32>
    %c23_i32_6 = arith.constant 23 : i32
    %48 = vector.broadcast %c23_i32_6 : i32 to vector<24x1xi32>
    %49 = arith.cmpi slt, %4, %48 : vector<24x1xi32>
    %50 = arith.andi %47, %49 : vector<24x1xi1>
    %cst_7 = arith.constant 0.000000e+00 : f32
    %51 = vector.shape_cast %50 : vector<24x1xi1> to vector<24x1xi1>
    %52 = vector.broadcast %51 : vector<24x1xi1> to vector<24x128xi1>
    %53 = vector.broadcast %cst_7 : f32 to vector<24x128xf32>
    %54 = arith.select %52, %45, %53 : vector<24x128xi1>, vector<24x128xf32>
    %c22_i32 = arith.constant 22 : i32
    %55 = tpu.dynamic_rotate %15 by %c22_i32 dim 0 : vector<24x128xf32>, i32 -> vector<24x128xf32>
    %c-2_i32 = arith.constant -2 : i32
    %56 = vector.broadcast %c-2_i32 : i32 to vector<24x1xi32>
    %57 = arith.cmpi sge, %4, %56 : vector<24x1xi32>
    %c22_i32_8 = arith.constant 22 : i32
    %58 = vector.broadcast %c22_i32_8 : i32 to vector<24x1xi32>
    %59 = arith.cmpi slt, %4, %58 : vector<24x1xi32>
    %60 = arith.andi %57, %59 : vector<24x1xi1>
    %cst_9 = arith.constant 0.000000e+00 : f32
    %61 = vector.shape_cast %60 : vector<24x1xi1> to vector<24x1xi1>
    %62 = vector.broadcast %61 : vector<24x1xi1> to vector<24x128xi1>
    %63 = vector.broadcast %cst_9 : f32 to vector<24x128xf32>
    %64 = arith.select %62, %55, %63 : vector<24x128xi1>, vector<24x128xf32>
    %65 = tpu.concatenate %25, %35, %44, %54, %64 in 1 : vector<24x128xf32>, vector<24x128xf32>, vector<24x128xf32>, vector<24x128xf32>, vector<24x128xf32> -> vector<24x640xf32>
    %c0_10 = arith.constant 0 : index
    %c0_11 = arith.constant 0 : index
    %c0_12 = arith.constant 0 : index
    %66 = vector.load %arg3[%c0_10, %c0_11, %c0_12] : memref<3x640x128xf32, #tpu.memory_space<vmem>>, vector<1x640x128xf32>
    %67 = vector.shape_cast %66 : vector<1x640x128xf32> to vector<640x128xf32>
    %cst_13 = arith.constant dense<0.000000e+00> : vector<24x128xf32>
    %68 = tpu.matmul %65, %67, %cst_13 {dimension_numbers = #tpu.dot_dimension_numbers<[1], [0], [0], [1], [0, 0, 1, 1], [], []>} : vector<24x640xf32>, vector<640x128xf32>, vector<24x128xf32> -> vector<24x128xf32>
    %c0_14 = arith.constant 0 : index
    %c0_15 = arith.constant 0 : index
    %c0_16 = arith.constant 0 : index
    %69 = vector.load %arg4[%c0_14, %c0_15, %c0_16] : memref<3x1x128xf32, #tpu.memory_space<vmem>>, vector<1x1x128xf32>
    %70 = vector.shape_cast %69 : vector<1x1x128xf32> to vector<1x128xf32>
    %71 = vector.broadcast %70 : vector<1x128xf32> to vector<24x128xf32>
    %72 = arith.addf %68, %71 : vector<24x128xf32>
    %cst_17 = arith.constant dense<0.000000e+00> : vector<24xf32>
    %73 = vector.multi_reduction <add>, %72, %cst_17 [1] : vector<24x128xf32> to vector<24xf32>
    %74 = vector.shape_cast %73 : vector<24xf32> to vector<24x1xf32>
    %cst_18 = arith.constant 0.020833334 : f32
    %75 = vector.broadcast %cst_18 : f32 to vector<24x1xf32>
    %76 = arith.mulf %74, %75 : vector<24x1xf32>
    %77 = vector.broadcast %76 : vector<24x1xf32> to vector<24x128xf32>
    %78 = arith.subf %72, %77 : vector<24x128xf32>
    %79 = vector.broadcast %13 : vector<1x128xf32> to vector<24x128xf32>
    %80 = arith.mulf %78, %79 : vector<24x128xf32>
    %81 = arith.mulf %80, %80 : vector<24x128xf32>
    %cst_19 = arith.constant dense<0.000000e+00> : vector<24xf32>
    %82 = vector.multi_reduction <add>, %81, %cst_19 [1] : vector<24x128xf32> to vector<24xf32>
    %83 = vector.shape_cast %82 : vector<24xf32> to vector<24x1xf32>
    %cst_20 = arith.constant 0.020833334 : f32
    %84 = vector.broadcast %cst_20 : f32 to vector<24x1xf32>
    %85 = arith.mulf %83, %84 : vector<24x1xf32>
    %cst_21 = arith.constant 9.99999974E-6 : f32
    %86 = vector.broadcast %cst_21 : f32 to vector<24x1xf32>
    %87 = arith.addf %85, %86 : vector<24x1xf32>
    %88 = math.rsqrt %87 : vector<24x1xf32>
    %89 = vector.broadcast %88 : vector<24x1xf32> to vector<24x128xf32>
    %90 = arith.mulf %80, %89 : vector<24x128xf32>
    %c0_22 = arith.constant 0 : index
    %c0_23 = arith.constant 0 : index
    %c0_24 = arith.constant 0 : index
    %91 = vector.load %arg5[%c0_22, %c0_23, %c0_24] : memref<3x1x128xf32, #tpu.memory_space<vmem>>, vector<1x1x128xf32>
    %92 = vector.shape_cast %91 : vector<1x1x128xf32> to vector<1x128xf32>
    %93 = vector.broadcast %92 : vector<1x128xf32> to vector<24x128xf32>
    %94 = arith.mulf %90, %93 : vector<24x128xf32>
    %c0_25 = arith.constant 0 : index
    %c0_26 = arith.constant 0 : index
    %c0_27 = arith.constant 0 : index
    %95 = vector.load %arg6[%c0_25, %c0_26, %c0_27] : memref<3x1x128xf32, #tpu.memory_space<vmem>>, vector<1x1x128xf32>
    %96 = vector.shape_cast %95 : vector<1x1x128xf32> to vector<1x128xf32>
    %97 = vector.broadcast %96 : vector<1x128xf32> to vector<24x128xf32>
    %98 = arith.addf %94, %97 : vector<24x128xf32>
    %cst_28 = arith.constant 0.000000e+00 : f32
    %99 = vector.broadcast %cst_28 : f32 to vector<24x128xf32>
    %100 = arith.maximumf %98, %99 : vector<24x128xf32>
    %101 = vector.broadcast %8 : vector<24x1xf32> to vector<24x128xf32>
    %102 = arith.mulf %100, %101 : vector<24x128xf32>
    %c2_i32_29 = arith.constant 2 : i32
    %103 = tpu.dynamic_rotate %102 by %c2_i32_29 dim 0 : vector<24x128xf32>, i32 -> vector<24x128xf32>
    %c2_i32_30 = arith.constant 2 : i32
    %104 = vector.broadcast %c2_i32_30 : i32 to vector<24x1xi32>
    %105 = arith.cmpi sge, %4, %104 : vector<24x1xi32>
    %c26_i32_31 = arith.constant 26 : i32
    %106 = vector.broadcast %c26_i32_31 : i32 to vector<24x1xi32>
    %107 = arith.cmpi slt, %4, %106 : vector<24x1xi32>
    %108 = arith.andi %105, %107 : vector<24x1xi1>
    %cst_32 = arith.constant 0.000000e+00 : f32
    %109 = vector.shape_cast %108 : vector<24x1xi1> to vector<24x1xi1>
    %110 = vector.broadcast %109 : vector<24x1xi1> to vector<24x128xi1>
    %111 = vector.broadcast %cst_32 : f32 to vector<24x128xf32>
    %112 = arith.select %110, %103, %111 : vector<24x128xi1>, vector<24x128xf32>
    %c1_i32_33 = arith.constant 1 : i32
    %113 = tpu.dynamic_rotate %102 by %c1_i32_33 dim 0 : vector<24x128xf32>, i32 -> vector<24x128xf32>
    %c1_i32_34 = arith.constant 1 : i32
    %114 = vector.broadcast %c1_i32_34 : i32 to vector<24x1xi32>
    %115 = arith.cmpi sge, %4, %114 : vector<24x1xi32>
    %c25_i32_35 = arith.constant 25 : i32
    %116 = vector.broadcast %c25_i32_35 : i32 to vector<24x1xi32>
    %117 = arith.cmpi slt, %4, %116 : vector<24x1xi32>
    %118 = arith.andi %115, %117 : vector<24x1xi1>
    %cst_36 = arith.constant 0.000000e+00 : f32
    %119 = vector.shape_cast %118 : vector<24x1xi1> to vector<24x1xi1>
    %120 = vector.broadcast %119 : vector<24x1xi1> to vector<24x128xi1>
    %121 = vector.broadcast %cst_36 : f32 to vector<24x128xf32>
    %122 = arith.select %120, %113, %121 : vector<24x128xi1>, vector<24x128xf32>
    %c0_i32_37 = arith.constant 0 : i32
    %123 = vector.broadcast %c0_i32_37 : i32 to vector<24x1xi32>
    %124 = arith.cmpi sge, %4, %123 : vector<24x1xi32>
    %c24_i32_38 = arith.constant 24 : i32
    %125 = vector.broadcast %c24_i32_38 : i32 to vector<24x1xi32>
    %126 = arith.cmpi slt, %4, %125 : vector<24x1xi32>
    %127 = arith.andi %124, %126 : vector<24x1xi1>
    %cst_39 = arith.constant 0.000000e+00 : f32
    %128 = vector.shape_cast %127 : vector<24x1xi1> to vector<24x1xi1>
    %129 = vector.broadcast %128 : vector<24x1xi1> to vector<24x128xi1>
    %130 = vector.broadcast %cst_39 : f32 to vector<24x128xf32>
    %131 = arith.select %129, %102, %130 : vector<24x128xi1>, vector<24x128xf32>
    %c23_i32_40 = arith.constant 23 : i32
    %132 = tpu.dynamic_rotate %102 by %c23_i32_40 dim 0 : vector<24x128xf32>, i32 -> vector<24x128xf32>
    %c-1_i32_41 = arith.constant -1 : i32
    %133 = vector.broadcast %c-1_i32_41 : i32 to vector<24x1xi32>
    %134 = arith.cmpi sge, %4, %133 : vector<24x1xi32>
    %c23_i32_42 = arith.constant 23 : i32
    %135 = vector.broadcast %c23_i32_42 : i32 to vector<24x1xi32>
    %136 = arith.cmpi slt, %4, %135 : vector<24x1xi32>
    %137 = arith.andi %134, %136 : vector<24x1xi1>
    %cst_43 = arith.constant 0.000000e+00 : f32
    %138 = vector.shape_cast %137 : vector<24x1xi1> to vector<24x1xi1>
    %139 = vector.broadcast %138 : vector<24x1xi1> to vector<24x128xi1>
    %140 = vector.broadcast %cst_43 : f32 to vector<24x128xf32>
    %141 = arith.select %139, %132, %140 : vector<24x128xi1>, vector<24x128xf32>
    %c22_i32_44 = arith.constant 22 : i32
    %142 = tpu.dynamic_rotate %102 by %c22_i32_44 dim 0 : vector<24x128xf32>, i32 -> vector<24x128xf32>
    %c-2_i32_45 = arith.constant -2 : i32
    %143 = vector.broadcast %c-2_i32_45 : i32 to vector<24x1xi32>
    %144 = arith.cmpi sge, %4, %143 : vector<24x1xi32>
    %c22_i32_46 = arith.constant 22 : i32
    %145 = vector.broadcast %c22_i32_46 : i32 to vector<24x1xi32>
    %146 = arith.cmpi slt, %4, %145 : vector<24x1xi32>
    %147 = arith.andi %144, %146 : vector<24x1xi1>
    %cst_47 = arith.constant 0.000000e+00 : f32
    %148 = vector.shape_cast %147 : vector<24x1xi1> to vector<24x1xi1>
    %149 = vector.broadcast %148 : vector<24x1xi1> to vector<24x128xi1>
    %150 = vector.broadcast %cst_47 : f32 to vector<24x128xf32>
    %151 = arith.select %149, %142, %150 : vector<24x128xi1>, vector<24x128xf32>
    %152 = tpu.concatenate %112, %122, %131, %141, %151 in 1 : vector<24x128xf32>, vector<24x128xf32>, vector<24x128xf32>, vector<24x128xf32>, vector<24x128xf32> -> vector<24x640xf32>
    %c1 = arith.constant 1 : index
    %c0_48 = arith.constant 0 : index
    %c0_49 = arith.constant 0 : index
    %153 = vector.load %arg3[%c1, %c0_48, %c0_49] : memref<3x640x128xf32, #tpu.memory_space<vmem>>, vector<1x640x128xf32>
    %154 = vector.shape_cast %153 : vector<1x640x128xf32> to vector<640x128xf32>
    %cst_50 = arith.constant dense<0.000000e+00> : vector<24x128xf32>
    %155 = tpu.matmul %152, %154, %cst_50 {dimension_numbers = #tpu.dot_dimension_numbers<[1], [0], [0], [1], [0, 0, 1, 1], [], []>} : vector<24x640xf32>, vector<640x128xf32>, vector<24x128xf32> -> vector<24x128xf32>
    %c1_51 = arith.constant 1 : index
    %c0_52 = arith.constant 0 : index
    %c0_53 = arith.constant 0 : index
    %156 = vector.load %arg4[%c1_51, %c0_52, %c0_53] : memref<3x1x128xf32, #tpu.memory_space<vmem>>, vector<1x1x128xf32>
    %157 = vector.shape_cast %156 : vector<1x1x128xf32> to vector<1x128xf32>
    %158 = vector.broadcast %157 : vector<1x128xf32> to vector<24x128xf32>
    %159 = arith.addf %155, %158 : vector<24x128xf32>
    %cst_54 = arith.constant dense<0.000000e+00> : vector<24xf32>
    %160 = vector.multi_reduction <add>, %159, %cst_54 [1] : vector<24x128xf32> to vector<24xf32>
    %161 = vector.shape_cast %160 : vector<24xf32> to vector<24x1xf32>
    %cst_55 = arith.constant 0.020833334 : f32
    %162 = vector.broadcast %cst_55 : f32 to vector<24x1xf32>
    %163 = arith.mulf %161, %162 : vector<24x1xf32>
    %164 = vector.broadcast %163 : vector<24x1xf32> to vector<24x128xf32>
    %165 = arith.subf %159, %164 : vector<24x128xf32>
    %166 = vector.broadcast %13 : vector<1x128xf32> to vector<24x128xf32>
    %167 = arith.mulf %165, %166 : vector<24x128xf32>
    %168 = arith.mulf %167, %167 : vector<24x128xf32>
    %cst_56 = arith.constant dense<0.000000e+00> : vector<24xf32>
    %169 = vector.multi_reduction <add>, %168, %cst_56 [1] : vector<24x128xf32> to vector<24xf32>
    %170 = vector.shape_cast %169 : vector<24xf32> to vector<24x1xf32>
    %cst_57 = arith.constant 0.020833334 : f32
    %171 = vector.broadcast %cst_57 : f32 to vector<24x1xf32>
    %172 = arith.mulf %170, %171 : vector<24x1xf32>
    %cst_58 = arith.constant 9.99999974E-6 : f32
    %173 = vector.broadcast %cst_58 : f32 to vector<24x1xf32>
    %174 = arith.addf %172, %173 : vector<24x1xf32>
    %175 = math.rsqrt %174 : vector<24x1xf32>
    %176 = vector.broadcast %175 : vector<24x1xf32> to vector<24x128xf32>
    %177 = arith.mulf %167, %176 : vector<24x128xf32>
    %c1_59 = arith.constant 1 : index
    %c0_60 = arith.constant 0 : index
    %c0_61 = arith.constant 0 : index
    %178 = vector.load %arg5[%c1_59, %c0_60, %c0_61] : memref<3x1x128xf32, #tpu.memory_space<vmem>>, vector<1x1x128xf32>
    %179 = vector.shape_cast %178 : vector<1x1x128xf32> to vector<1x128xf32>
    %180 = vector.broadcast %179 : vector<1x128xf32> to vector<24x128xf32>
    %181 = arith.mulf %177, %180 : vector<24x128xf32>
    %c1_62 = arith.constant 1 : index
    %c0_63 = arith.constant 0 : index
    %c0_64 = arith.constant 0 : index
    %182 = vector.load %arg6[%c1_62, %c0_63, %c0_64] : memref<3x1x128xf32, #tpu.memory_space<vmem>>, vector<1x1x128xf32>
    %183 = vector.shape_cast %182 : vector<1x1x128xf32> to vector<1x128xf32>
    %184 = vector.broadcast %183 : vector<1x128xf32> to vector<24x128xf32>
    %185 = arith.addf %181, %184 : vector<24x128xf32>
    %cst_65 = arith.constant 0.000000e+00 : f32
    %186 = vector.broadcast %cst_65 : f32 to vector<24x128xf32>
    %187 = arith.maximumf %185, %186 : vector<24x128xf32>
    %188 = vector.broadcast %8 : vector<24x1xf32> to vector<24x128xf32>
    %189 = arith.mulf %187, %188 : vector<24x128xf32>
    %c2_i32_66 = arith.constant 2 : i32
    %190 = tpu.dynamic_rotate %189 by %c2_i32_66 dim 0 : vector<24x128xf32>, i32 -> vector<24x128xf32>
    %c2_i32_67 = arith.constant 2 : i32
    %191 = vector.broadcast %c2_i32_67 : i32 to vector<24x1xi32>
    %192 = arith.cmpi sge, %4, %191 : vector<24x1xi32>
    %c26_i32_68 = arith.constant 26 : i32
    %193 = vector.broadcast %c26_i32_68 : i32 to vector<24x1xi32>
    %194 = arith.cmpi slt, %4, %193 : vector<24x1xi32>
    %195 = arith.andi %192, %194 : vector<24x1xi1>
    %cst_69 = arith.constant 0.000000e+00 : f32
    %196 = vector.shape_cast %195 : vector<24x1xi1> to vector<24x1xi1>
    %197 = vector.broadcast %196 : vector<24x1xi1> to vector<24x128xi1>
    %198 = vector.broadcast %cst_69 : f32 to vector<24x128xf32>
    %199 = arith.select %197, %190, %198 : vector<24x128xi1>, vector<24x128xf32>
    %c1_i32_70 = arith.constant 1 : i32
    %200 = tpu.dynamic_rotate %189 by %c1_i32_70 dim 0 : vector<24x128xf32>, i32 -> vector<24x128xf32>
    %c1_i32_71 = arith.constant 1 : i32
    %201 = vector.broadcast %c1_i32_71 : i32 to vector<24x1xi32>
    %202 = arith.cmpi sge, %4, %201 : vector<24x1xi32>
    %c25_i32_72 = arith.constant 25 : i32
    %203 = vector.broadcast %c25_i32_72 : i32 to vector<24x1xi32>
    %204 = arith.cmpi slt, %4, %203 : vector<24x1xi32>
    %205 = arith.andi %202, %204 : vector<24x1xi1>
    %cst_73 = arith.constant 0.000000e+00 : f32
    %206 = vector.shape_cast %205 : vector<24x1xi1> to vector<24x1xi1>
    %207 = vector.broadcast %206 : vector<24x1xi1> to vector<24x128xi1>
    %208 = vector.broadcast %cst_73 : f32 to vector<24x128xf32>
    %209 = arith.select %207, %200, %208 : vector<24x128xi1>, vector<24x128xf32>
    %c0_i32_74 = arith.constant 0 : i32
    %210 = vector.broadcast %c0_i32_74 : i32 to vector<24x1xi32>
    %211 = arith.cmpi sge, %4, %210 : vector<24x1xi32>
    %c24_i32_75 = arith.constant 24 : i32
    %212 = vector.broadcast %c24_i32_75 : i32 to vector<24x1xi32>
    %213 = arith.cmpi slt, %4, %212 : vector<24x1xi32>
    %214 = arith.andi %211, %213 : vector<24x1xi1>
    %cst_76 = arith.constant 0.000000e+00 : f32
    %215 = vector.shape_cast %214 : vector<24x1xi1> to vector<24x1xi1>
    %216 = vector.broadcast %215 : vector<24x1xi1> to vector<24x128xi1>
    %217 = vector.broadcast %cst_76 : f32 to vector<24x128xf32>
    %218 = arith.select %216, %189, %217 : vector<24x128xi1>, vector<24x128xf32>
    %c23_i32_77 = arith.constant 23 : i32
    %219 = tpu.dynamic_rotate %189 by %c23_i32_77 dim 0 : vector<24x128xf32>, i32 -> vector<24x128xf32>
    %c-1_i32_78 = arith.constant -1 : i32
    %220 = vector.broadcast %c-1_i32_78 : i32 to vector<24x1xi32>
    %221 = arith.cmpi sge, %4, %220 : vector<24x1xi32>
    %c23_i32_79 = arith.constant 23 : i32
    %222 = vector.broadcast %c23_i32_79 : i32 to vector<24x1xi32>
    %223 = arith.cmpi slt, %4, %222 : vector<24x1xi32>
    %224 = arith.andi %221, %223 : vector<24x1xi1>
    %cst_80 = arith.constant 0.000000e+00 : f32
    %225 = vector.shape_cast %224 : vector<24x1xi1> to vector<24x1xi1>
    %226 = vector.broadcast %225 : vector<24x1xi1> to vector<24x128xi1>
    %227 = vector.broadcast %cst_80 : f32 to vector<24x128xf32>
    %228 = arith.select %226, %219, %227 : vector<24x128xi1>, vector<24x128xf32>
    %c22_i32_81 = arith.constant 22 : i32
    %229 = tpu.dynamic_rotate %189 by %c22_i32_81 dim 0 : vector<24x128xf32>, i32 -> vector<24x128xf32>
    %c-2_i32_82 = arith.constant -2 : i32
    %230 = vector.broadcast %c-2_i32_82 : i32 to vector<24x1xi32>
    %231 = arith.cmpi sge, %4, %230 : vector<24x1xi32>
    %c22_i32_83 = arith.constant 22 : i32
    %232 = vector.broadcast %c22_i32_83 : i32 to vector<24x1xi32>
    %233 = arith.cmpi slt, %4, %232 : vector<24x1xi32>
    %234 = arith.andi %231, %233 : vector<24x1xi1>
    %cst_84 = arith.constant 0.000000e+00 : f32
    %235 = vector.shape_cast %234 : vector<24x1xi1> to vector<24x1xi1>
    %236 = vector.broadcast %235 : vector<24x1xi1> to vector<24x128xi1>
    %237 = vector.broadcast %cst_84 : f32 to vector<24x128xf32>
    %238 = arith.select %236, %229, %237 : vector<24x128xi1>, vector<24x128xf32>
    %239 = tpu.concatenate %199, %209, %218, %228, %238 in 1 : vector<24x128xf32>, vector<24x128xf32>, vector<24x128xf32>, vector<24x128xf32>, vector<24x128xf32> -> vector<24x640xf32>
    %c2 = arith.constant 2 : index
    %c0_85 = arith.constant 0 : index
    %c0_86 = arith.constant 0 : index
    %240 = vector.load %arg3[%c2, %c0_85, %c0_86] : memref<3x640x128xf32, #tpu.memory_space<vmem>>, vector<1x640x128xf32>
    %241 = vector.shape_cast %240 : vector<1x640x128xf32> to vector<640x128xf32>
    %cst_87 = arith.constant dense<0.000000e+00> : vector<24x128xf32>
    %242 = tpu.matmul %239, %241, %cst_87 {dimension_numbers = #tpu.dot_dimension_numbers<[1], [0], [0], [1], [0, 0, 1, 1], [], []>} : vector<24x640xf32>, vector<640x128xf32>, vector<24x128xf32> -> vector<24x128xf32>
    %c2_88 = arith.constant 2 : index
    %c0_89 = arith.constant 0 : index
    %c0_90 = arith.constant 0 : index
    %243 = vector.load %arg4[%c2_88, %c0_89, %c0_90] : memref<3x1x128xf32, #tpu.memory_space<vmem>>, vector<1x1x128xf32>
    %244 = vector.shape_cast %243 : vector<1x1x128xf32> to vector<1x128xf32>
    %245 = vector.broadcast %244 : vector<1x128xf32> to vector<24x128xf32>
    %246 = arith.addf %242, %245 : vector<24x128xf32>
    %cst_91 = arith.constant dense<0.000000e+00> : vector<24xf32>
    %247 = vector.multi_reduction <add>, %246, %cst_91 [1] : vector<24x128xf32> to vector<24xf32>
    %248 = vector.shape_cast %247 : vector<24xf32> to vector<24x1xf32>
    %cst_92 = arith.constant 0.020833334 : f32
    %249 = vector.broadcast %cst_92 : f32 to vector<24x1xf32>
    %250 = arith.mulf %248, %249 : vector<24x1xf32>
    %251 = vector.broadcast %250 : vector<24x1xf32> to vector<24x128xf32>
    %252 = arith.subf %246, %251 : vector<24x128xf32>
    %253 = vector.broadcast %13 : vector<1x128xf32> to vector<24x128xf32>
    %254 = arith.mulf %252, %253 : vector<24x128xf32>
    %255 = arith.mulf %254, %254 : vector<24x128xf32>
    %cst_93 = arith.constant dense<0.000000e+00> : vector<24xf32>
    %256 = vector.multi_reduction <add>, %255, %cst_93 [1] : vector<24x128xf32> to vector<24xf32>
    %257 = vector.shape_cast %256 : vector<24xf32> to vector<24x1xf32>
    %cst_94 = arith.constant 0.020833334 : f32
    %258 = vector.broadcast %cst_94 : f32 to vector<24x1xf32>
    %259 = arith.mulf %257, %258 : vector<24x1xf32>
    %cst_95 = arith.constant 9.99999974E-6 : f32
    %260 = vector.broadcast %cst_95 : f32 to vector<24x1xf32>
    %261 = arith.addf %259, %260 : vector<24x1xf32>
    %262 = math.rsqrt %261 : vector<24x1xf32>
    %263 = vector.broadcast %262 : vector<24x1xf32> to vector<24x128xf32>
    %264 = arith.mulf %254, %263 : vector<24x128xf32>
    %c2_96 = arith.constant 2 : index
    %c0_97 = arith.constant 0 : index
    %c0_98 = arith.constant 0 : index
    %265 = vector.load %arg5[%c2_96, %c0_97, %c0_98] : memref<3x1x128xf32, #tpu.memory_space<vmem>>, vector<1x1x128xf32>
    %266 = vector.shape_cast %265 : vector<1x1x128xf32> to vector<1x128xf32>
    %267 = vector.broadcast %266 : vector<1x128xf32> to vector<24x128xf32>
    %268 = arith.mulf %264, %267 : vector<24x128xf32>
    %c2_99 = arith.constant 2 : index
    %c0_100 = arith.constant 0 : index
    %c0_101 = arith.constant 0 : index
    %269 = vector.load %arg6[%c2_99, %c0_100, %c0_101] : memref<3x1x128xf32, #tpu.memory_space<vmem>>, vector<1x1x128xf32>
    %270 = vector.shape_cast %269 : vector<1x1x128xf32> to vector<1x128xf32>
    %271 = vector.broadcast %270 : vector<1x128xf32> to vector<24x128xf32>
    %272 = arith.addf %268, %271 : vector<24x128xf32>
    %cst_102 = arith.constant 0.000000e+00 : f32
    %273 = vector.broadcast %cst_102 : f32 to vector<24x128xf32>
    %274 = arith.maximumf %272, %273 : vector<24x128xf32>
    %c0_103 = arith.constant 0 : index
    %c0_104 = arith.constant 0 : index
    %275 = vector.load %arg7[%c0_103, %c0_104] : memref<128x128xf32, #tpu.memory_space<vmem>>, vector<128x128xf32>
    %cst_105 = arith.constant dense<0.000000e+00> : vector<24x128xf32>
    %276 = tpu.matmul %274, %275, %cst_105 {dimension_numbers = #tpu.dot_dimension_numbers<[1], [0], [0], [1], [0, 0, 1, 1], [], []>} : vector<24x128xf32>, vector<128x128xf32>, vector<24x128xf32> -> vector<24x128xf32>
    %c0_106 = arith.constant 0 : index
    %c0_107 = arith.constant 0 : index
    %277 = vector.load %arg8[%c0_106, %c0_107] : memref<1x128xf32, #tpu.memory_space<vmem>>, vector<1x128xf32>
    %278 = vector.broadcast %277 : vector<1x128xf32> to vector<24x128xf32>
    %279 = arith.addf %276, %278 : vector<24x128xf32>
    %280 = arith.addf %279, %3 : vector<24x128xf32>
    %281 = vector.broadcast %8 : vector<24x1xf32> to vector<24x128xf32>
    %282 = arith.mulf %280, %281 : vector<24x128xf32>
    %c0_108 = arith.constant 0 : index
    %c0_109 = arith.constant 0 : index
    %c0_110 = arith.constant 0 : index
    %283 = vector.load %arg9[%c0_108, %c0_109, %c0_110] : memref<1x24x128xf32, #tpu.memory_space<vmem>>, vector<1x24x128xf32>
    %284 = vector.shape_cast %283 : vector<1x24x128xf32> to vector<24x128xf32>
    %285 = vector.shape_cast %282 : vector<24x128xf32> to vector<1x24x128xf32>
    tpu.vector_store %arg9[%c0_108, %c0_109, %c0_110], %285 {strides = array<i32>} : memref<1x24x128xf32, #tpu.memory_space<vmem>>, vector<1x24x128xf32>,
    return
  }
  func.func @transform_0(%arg0: i32, %arg1: memref<2xi32, #tpu.memory_space<smem>>) -> (i32, i32, i32) {
    %c0_i32 = arith.constant 0 : i32
    %c0_i32_0 = arith.constant 0 : i32
    %c0_i32_1 = arith.constant 0 : i32
    return %arg0, %c0_i32, %c0_i32_0 : i32, i32, i32
  }
  func.func @transform_1(%arg0: i32, %arg1: memref<2xi32, #tpu.memory_space<smem>>) -> (i32, i32, i32) {
    %c0_i32 = arith.constant 0 : i32
    %c0_i32_0 = arith.constant 0 : i32
    %c0_i32_1 = arith.constant 0 : i32
    %c0_i32_2 = arith.constant 0 : i32
    return %c0_i32, %c0_i32_0, %c0_i32_1 : i32, i32, i32
  }
  func.func @transform_2(%arg0: i32, %arg1: memref<2xi32, #tpu.memory_space<smem>>) -> (i32, i32, i32) {
    %c0_i32 = arith.constant 0 : i32
    %c0_i32_0 = arith.constant 0 : i32
    %c0_i32_1 = arith.constant 0 : i32
    %c0_i32_2 = arith.constant 0 : i32
    return %c0_i32, %c0_i32_0, %c0_i32_1 : i32, i32, i32
  }
  func.func @transform_3(%arg0: i32, %arg1: memref<2xi32, #tpu.memory_space<smem>>) -> (i32, i32, i32) {
    %c0_i32 = arith.constant 0 : i32
    %c0_i32_0 = arith.constant 0 : i32
    %c0_i32_1 = arith.constant 0 : i32
    %c0_i32_2 = arith.constant 0 : i32
    return %c0_i32, %c0_i32_0, %c0_i32_1 : i32, i32, i32
  }
  func.func @transform_4(%arg0: i32, %arg1: memref<2xi32, #tpu.memory_space<smem>>) -> (i32, i32, i32) {
    %c0_i32 = arith.constant 0 : i32
    %c0_i32_0 = arith.constant 0 : i32
    %c0_i32_1 = arith.constant 0 : i32
    %c0_i32_2 = arith.constant 0 : i32
    return %c0_i32, %c0_i32_0, %c0_i32_1 : i32, i32, i32
  }
  func.func @transform_5(%arg0: i32, %arg1: memref<2xi32, #tpu.memory_space<smem>>) -> (i32, i32) {
    %c0_i32 = arith.constant 0 : i32
    %c0_i32_0 = arith.constant 0 : i32
    %c0_i32_1 = arith.constant 0 : i32
    return %c0_i32, %c0_i32_0 : i32, i32
  }
  func.func @transform_6(%arg0: i32, %arg1: memref<2xi32, #tpu.memory_space<smem>>) -> (i32, i32) {
    %c0_i32 = arith.constant 0 : i32
    %c0_i32_0 = arith.constant 0 : i32
    %c0_i32_1 = arith.constant 0 : i32
    return %c0_i32, %c0_i32_0 : i32, i32
  }
  func.func @transform_7(%arg0: i32, %arg1: memref<2xi32, #tpu.memory_space<smem>>) -> (i32, i32, i32) {
    %c0_i32 = arith.constant 0 : i32
    %c0_i32_0 = arith.constant 0 : i32
    %c0_i32_1 = arith.constant 0 : i32
    return %arg0, %c0_i32, %c0_i32_0 : i32, i32, i32
  }
}

</mosaic_0001>

<bundles_post_ra>
// kernel: tpu_custom_call.1
= control target key start
LH: loop header
LB: loop body
LE: loop exit
PB: predicated region body
PF: predicated region fallthrough
CT: control target
= control target key end

     0   :  { %s2732_s27 = smov [#allocation3]   ;;  %s3382_s0 = inlined_call_operand.hbm [shape: s32[2], index: 0, kind: input, shape index: {}]   ;;  %s3383_s1 = inlined_call_operand.hbm [shape: f32[2,24,128], index: 1, kind: input, shape index: {}]   ;;  %s3384_s2 = inlined_call_operand.hbm [shape: f32[3,640,128], index: 2, kind: input, shape index: {}]   ;;  %s3385_s3 = inlined_call_operand.vmem [shape: f32[3,1,128], index: 3, kind: input, shape index: {}]   ;;  %s3386_s4 = inlined_call_operand.vmem [shape: f32[3,1,128], index: 4, kind: input, shape index: {}]   ;;  %s3387_s5 = inlined_call_operand.vmem [shape: f32[3,1,128], index: 5, kind: input, shape index: {}]   ;;  %s3388_s6 = inlined_call_operand.hbm [shape: f32[128,128], index: 6, kind: input, shape index: {}]   ;;  %s3389_s7 = inlined_call_operand.vmem [shape: f32[1,128], index: 7, kind: input, shape index: {}]   ;;  %s3390_s8 = inlined_call_operand.hbm [shape: f32[2,24,128], index: 8, kind: output, shape index: {}]  }
   0x1   :  { %3397 = sst [smem:[#allocation15_spill]] %s3384_s2 }
   0x2   :  { %14 = dma.hbm_to_smem %s3382_s0, 16, %s2732_s27, [#allocation2] }
   0x3   :  { %2702 = dma.done.wait [#allocation2], 16 }
   0x4   :  { %2703 = vsyncadd [#allocation2], 4294967280 }
   0x5   :  { %16 = sfence }
   0x6   :  { %17 = vsyncpa [#allocation5], 0 }
   0x7   :  { %19 = vsyncpa [#allocation5 + $0x1], 0 }
   0x8   :  { %20 = vsyncpa [#allocation8], 0 }
   0x9   :  { %21 = vsyncpa [#allocation6], 0 }
   0xa   :  { %23 = vsyncpa [#allocation6 + $0x1], 0  ;;  %s2791_s30 = smov 0   ;;  %s2793_s9 = smov 0  }
   0xb   :  { %s2795_s10 = smov 0   ;;  %s2797_s11 = smov 0  }
   0xc LB: > { %s2812_s0 = sadd.s32 4294967295, %s2730_s11   ;;  %s1943_s12 = sadd.s32 4294967294, %s2730_s11   ;;  %s2730_s11 = sphi %s2797_s11, %s3417_s11   ;;  %s2726_s10 = sphi %s2795_s10, %s3416_s10   ;;  %s2722_s9 = sphi %s2793_s9, %s3415_s9   ;;  %s2718_s30 = sphi %s2791_s30, %s3414_s30  }
   0xd   : > { %p49_p0 = scmp.ne.s32.totalorder %s2722_s9, %s2718_s30  ;;  %p3393_p1 = scmp.eq.s32.totalorder %s2812_s0, 0 }
   0xe   : > { %p199_p2 = scmp.eq.s32.totalorder %s2812_s0, 1  ;;  %p205_p3 = scmp.eq.s32.totalorder %s1943_s12, 1 }
   0xf   : > { %p2821_p4 = por %p3393_p1, %p49_p0  ;;  %p1944_p5 = scmp.ge.s32.totalorder %s2730_s11, 1 }
  0x10   : > { %p2826_p6 = por %p205_p3, %p49_p0  ;;  %p212_p7 = scmp.lt.s32.totalorder %s2730_s11, 3 }
  0x11   : > { %s3398_s13 = scalar_select %p2821_p4, 1, 0 }
  0x12   : > { %s3399_s14 = scalar_select %p2826_p6, 1, 0 }
  0x13   : > { %p2831_p8 = pnand %p1944_p5, %p212_p7  ;;  %s2733_s16 = smov [#allocation7]  }
  0x14   : > { %s224_s17 = sshll.u32 %s2733_s16, 4  ;;  %s2734_s19 = smov [#allocation9]   ;;  %s225_s17 = int_to_ptr.vmem [resolvable:$true] %s224_s17 }
  0x15   : > { %s3400_s15 = scalar_select %p2831_p8, 1, 0 }
  0x16   : > { %p2489_p9 = pneg %p2831_p8  ;;  %s246_s20 = sshll.u32 %s2734_s19, 4  ;;  %s247_s20 = int_to_ptr.vmem [resolvable:$true] %s246_s20 }
  0x17   : > { %s2591_s21 = scalar_lea.vmem %s225_s17, 30720  ;;  %p2599_p5 = scmp.lt.s32.totalorder %s225_s17, %s225_s17 }
  0x18   : > { %p2840_p11 = pnand %p2489_p9, %p3393_p1  ;;  %p2592_p13 = scmp.ne.s32.totalorder %s225_s17, %s2591_s21 }
  0x19   : > { %p2600_p7 = scmp.lt.s32.totalorder %s2591_s21, %s2591_s21 }
  0x1a   : > { %p2582_p12 = pneg %p2840_p11 }
  0x1b   : > { %p2601_p10 = por %p2600_p7, %p2599_p5 }
  0x1c   : > { %p2594_p0 = pnand %p2592_p13, %p2582_p12 }
  0x1e   : > { %p2595_p3 = pneg %p2594_p0 }
  0x20   : > { %p2602_p9 = pnand %p2601_p10, %p2595_p3 }
  0x22   : > { %2605 = shalt.err (!%p2602_p9)
}
  0x23   : > { %s3391_s22 = smov 128   ;;  %s3392_s23 = smov 8  }
  0x24   : > { %s3402_s2 = sld [smem:[#allocation15_spill]]  ;;  %s2617_s26 = scalar_lea.vmem %s247_s20, 2048 }
  0x25   : > { %p2618_p13 = scmp.ne.s32.totalorder %s247_s20, %s2617_s26  ;;  %p2625_p10 = scmp.lt.s32.totalorder %s247_s20, %s247_s20 }
  0x26   : > { %p2626_p3 = scmp.lt.s32.totalorder %s2617_s26, %s2617_s26 }
  0x27   : > { %p2620_p0 = pnand %p2618_p13, %p2582_p12 }
  0x28   : > { %p2627_p7 = por %p2626_p3, %p2625_p10 }
  0x29   : > { %p2621_p5 = pneg %p2620_p0 }
  0x2a   : > { %2492 = dma.hbm_to_vmem [thread:$0]  (!%p2840_p11), %s3402_s2, 30720, %s225_s17, [#allocation8], %s3391_s22, %s3391_s22, %s3392_s23  }
  0x2b   : > { %p2628_p9 = pnand %p2627_p7, %p2621_p5 }
  0x2d   : > { %2631 = shalt.err (!%p2628_p9)
}
  0x2e   : > { %2495 = dma.hbm_to_vmem [thread:$0]  (!%p2840_p11), %s3388_s6, 2048, %s247_s20, [#allocation8], %s3391_s22, %s3391_s22, %s3392_s23  }
  0x2f   : > { %s2869_s29 = sadd.s32 1, %s2730_s11   ;;  %s36_s12 = sadd.s32 1, %s2726_s10 }
  0x30   : > { %s33_s16 = ssub.s32 %s2730_s11, %s2869_s29  ;;  %p43_p12 = scmp.ne.s32.totalorder %s2726_s10, %s2722_s9 }
  0x31   : > { %p34_p13 = scmp.eq.s32.totalorder %s33_s16, 0  ;;  %p44_p0 = scmp.eq.s32.totalorder %s2730_s11, 0 }
  0x32   : > { %p2879_p5 = por %p199_p2, %p43_p12  ;;  %p2506_p10 = scmp.lt.s32.totalorder %s2730_s11, 2 }
  0x33   : > { %s2885_s18 = scalar_select %p34_p13, %s2726_s10, %s36_s12  }
  0x34   : > { %s3403_s17 = scalar_select %p2879_p5, 1, 0 }
  0x35   : > { %p45_p3 = por %p44_p0, %p43_p12  ;;  %s263_s19 = sand.u32 1, %s2726_s10  }
  0x36   : > { %s2473_s21 = smul.u32 24, %s263_s19  ;;  %s2900_s16 = scalar_lea.sflag [#allocation5], %s263_s19 }
  0x37   : > { %s2474_s20 = smul.u32 384, %s2730_s11  ;;  %p2889_p11 = pnand %p2506_p10, %p45_p3 }
  0x38   : > { %s267_s28 = scalar_lea.vmem [#allocation4], %s2473_s21 }
  0x39   : > { %s2896_s27 = scalar_lea.hbm %s3383_s1, %s2474_s20  ;;  %s274_s12 = sshll.u32 %s267_s28, 4  ;;  %s2898_s12 = int_to_ptr.vmem [resolvable:$true] %s274_s12 }
  0x3a   : > { %s2632_s22 = scalar_lea.hbm %s2896_s27, 384  ;;  %p2634_p7 = pneg %p2889_p11 }
  0x3b   : > { %p2633_p2 = scmp.ne.s32.totalorder %s2896_s27, %s2632_s22  ;;  %s2637_s20 = scalar_lea.hbm %s3383_s1, 768 }
  0x3c   : > { %p2638_p13 = scmp.lt.s32.totalorder %s2896_s27, %s3383_s1  ;;  %p2639_p0 = scmp.lt.s32.totalorder %s2637_s20, %s2632_s22 }
  0x3d   : > { %p2635_p9 = pnand %p2634_p7, %p2633_p2 }
  0x3e   : > { %p2640_p10 = por %p2639_p0, %p2638_p13 }
  0x3f   : > { %p2636_p12 = pneg %p2635_p9 }
  0x41   : > { %p2641_p3 = pnand %p2640_p10, %p2636_p12 }
  0x43   : > { %2644 = shalt.err (!%p2641_p3)
}
  0x44   : > { %s2645_s19 = scalar_lea.vmem %s2898_s12, 384  ;;  %s2737_s21 = smov [#allocation4]  }
  0x45   : > { %p2646_p1 = scmp.ne.s32.totalorder %s2898_s12, %s2645_s19  ;;  %s2650_s28 = sshll.u32 %s2737_s21, 4  ;;  %s2651_s28 = int_to_ptr.vmem [resolvable:$false] %s2650_s28 }
  0x46   : > { %s2652_s23 = scalar_lea.vmem %s2651_s28, 768  ;;  %p2653_p9 = scmp.lt.s32.totalorder %s2898_s12, %s2651_s28 }
  0x47   : > { %p2648_p6 = pnand %p2646_p1, %p2634_p7  ;;  %p2654_p5 = scmp.lt.s32.totalorder %s2652_s23, %s2645_s19 }
  0x49   : > { %p2649_p2 = pneg %p2648_p6  ;;  %p2655_p4 = por %p2654_p5, %p2653_p9 }
  0x4b   : > { %p2656_p8 = pnand %p2655_p4, %p2649_p2 }
  0x4d   : > { %2659 = shalt.err (!%p2656_p8)
}
  0x4e   : > { %s3405_s2 = smov 8   ;;  %s3406_s22 = smov 128  }
  0x4f   : > { %2499 = dma.hbm_to_vmem [thread:$0]  (!%p2889_p11), %s2896_s27, 384, %s2898_s12, %s2900_s16, %s3406_s22, %s3406_s22, %s3405_s2  }
  0x50   : > { %p3407_p1 = scmp.ne.s32.totalorder %s3400_s15, 0 }
  0x51   : > { %s2927_s25 = sand.u32 (!%p3407_p1), 1, %s2722_s9   ;;  %p3408_p4 = scmp.ne.s32.totalorder (!%p3407_p1), %s3398_s13, 0 }
  0x52   : > { %286 = sbr.rel (%p3407_p1) target bundleno = 1986 (0x7c2), region = 48  ;;  %s289_s26 = scalar_lea.sflag (!%p3407_p1), [#allocation5], %s2927_s25 }
  0x53   : > { %s2475_s20 = smul.u32 (!%p3407_p1), 24, %s2927_s25 }
  0x55   : > { %s2933_s24 = scalar_lea.vmem (!%p3407_p1), [#allocation4], %s2475_s20 }
  0x57   : > { %2705 = dma.done.wait (%p3408_p4), %s289_s26, 384  }
  0x58   : > { %2707 = vsyncadd (%p3408_p4), %s289_s26, 4294966912  ;;  %p3409_p6 = scmp.eq.s32.totalorder %s2812_s0, 0 }
  0x5a   : > { %2709 = dma.done.wait (%p3409_p6), [#allocation8], 32768   ;;  %p3410_p8 = pmov %p3409_p6 }
  0x5b   : > { %v506_v0 = vld [vmem:[#allocation7 + $0xf8] sm:$0xff]  ;;  %v505_v2 = vld [vmem:[#allocation7 + $0xf0] sm:$0xff]  ;;  %v504_v6 = vld [vmem:[#allocation7 + $0xe8] sm:$0xff]  ;;  %v335_v11 = vlaneseq  ;;  %s2944_s13 = sld [smem:[#allocation3 + %s2812_s0]]  ;;  %v2738_v46 = vmov 0.0   ;;  %vm2739_vm9 = vmmov 0  }
  0x5c   : > { %2711 = vsyncadd (%p3410_p8), [#allocation8], 4294934528  ;;  %v490_v1 = vld [vmem:[#allocation7 + $0x78] sm:$0xff]  ;;  %1987 = vmatprep.subr.mxu0 %v506_v0  ;;  %v489_v4 = vld [vmem:[#allocation7 + $0x70] sm:$0xff]  ;;  %s330_s2 = scalar_lea.vmem [#allocation10], %s2475_s20  ;;  %s2476_s26 = smul.u32 384, %s2812_s0 }
  0x5d   : > { %v538_v3 = vld [vmem:[#allocation7 + $0x1f8] sm:$0xff]  ;;  %1988 = vmatpush3.msra.mxu0 %v490_v1  ;;  %v537_v7 = vld [vmem:[#allocation7 + $0x1f0] sm:$0xff]  ;;  %v488_v8 = vld [vmem:[#allocation7 + $0x68] sm:$0xff]  ;;  %v2947_v20 = vshrl.u32 %v335_v11, 7  ;;  %s1851_s22 = sshll.u32 %s330_s2, 4  ;;  %s1838_s27 = scalar_lea.sflag [#allocation6], %s2927_s25  ;;  %s3332_s22 = int_to_ptr.vmem [resolvable:$true] %s1851_s22 }
  0x5e   : > { %v522_v5 = vld [vmem:[#allocation7 + $0x178] sm:$0xff]  ;;  %2028 = vmatprep.subr.mxu1 %v538_v3  ;;  %1989 = vmatprep.subr.mxu0 %v505_v2  ;;  %v521_v9 = vld [vmem:[#allocation7 + $0x170] sm:$0xff]  ;;  %v536_v10 = vld [vmem:[#allocation7 + $0x1e8] sm:$0xff]  ;;  %s3339_s15 = scalar_lea.hbm %s3390_s8, %s2476_s26  ;;  %s2660_s12 = scalar_lea.vmem %s3332_s22, 384 }
  0x5f   : > { %2029 = vmatpush3.msra.mxu1 %v522_v5  ;;  %1990 = vmatpush3.msra.mxu0 %v489_v4  ;;  %v503_v12 = vld [vmem:[#allocation7 + $0xe0] sm:$0xff]  ;;  %v520_v13 = vld [vmem:[#allocation7 + $0x168] sm:$0xff]  ;;  %v502_v16 = vld [vmem:[#allocation7 + $0xd8] sm:$0xff]  ;;  %v2950_v29 = vadd.s32 16, %v2947_v20  ;;  %v337_v37 = vadd.s32 8, %v2947_v20  ;;  %vm385_vm3 = vcmp.lt.s32.totalorder %v2947_v20, 1  ;;  %p2661_p5 = scmp.ne.s32.totalorder %s3332_s22, %s2660_s12 }
  0x60   : > { %2030 = vmatprep.subr.mxu1 %v537_v7  ;;  %1991 = vmatprep.subr.mxu0 %v504_v6  ;;  %v487_v14 = vld [vmem:[#allocation7 + $0x60] sm:$0xff]  ;;  %v486_v18 = vld [vmem:[#allocation7 + $0x58] sm:$0xff]  ;;  %v501_v21 = vld [vmem:[#allocation7 + $0xd0] sm:$0xff]  ;;  %vm360_vm4 = vcmp.lt.s32.totalorder %v2947_v20, 2  ;;  %vm389_vm5 = vcmp.ge.s32.totalorder %v2947_v20, 1  ;;  %vm428_vm6 = vcmp.lt.s32.totalorder %v2947_v20, 7 }
  0x61   : > { %2031 = vmatpush3.msra.mxu1 %v521_v9  ;;  %v535_v15 = vld [vmem:[#allocation7 + $0x1e0] sm:$0xff]  ;;  %1992 = vmatpush3.msra.mxu0 %v488_v8  ;;  %v534_v19 = vld [vmem:[#allocation7 + $0x1d8] sm:$0xff]  ;;  %v485_v23 = vld [vmem:[#allocation7 + $0x50] sm:$0xff]  ;;  %v339_v32 = vstv %s2944_s13  ;;  %vm364_vm7 = vcmp.ge.s32.totalorder %v2947_v20, 2  ;;  %vm437_vm8 = vcmp.lt.s32.totalorder %v2950_v29, 23  ;;  %vm453_vm10 = vcmp.lt.s32.totalorder %v2947_v20, 6 }
  0x62   : > { %2032 = vmatprep.subr.mxu1 %v536_v10  ;;  %v519_v17 = vld [vmem:[#allocation7 + $0x160] sm:$0xff]  ;;  %1993 = vmatprep.subr.mxu0 %v503_v12  ;;  %v518_v22 = vld [vmem:[#allocation7 + $0x158] sm:$0xff]  ;;  %v533_v24 = vld [vmem:[#allocation7 + $0x1d0] sm:$0xff]  ;;  %vm340_vm0 = vcmp.lt.s32.totalorder %v2947_v20, %v339_v32  ;;  %vm342_vm1 = vcmp.lt.s32.totalorder %v2950_v29, %v339_v32  ;;  %vm341_vm2 = vcmp.lt.s32.totalorder %v337_v37, %v339_v32  ;;  %vm462_vm11 = vcmp.lt.s32.totalorder %v2950_v29, 22  ;;  %p3411_p11 = scmp.ne.s32.totalorder %s3403_s17, 0  ;;  %s2740_s0 = smov [#allocation10]  }
  0x63   : > { %2033 = vmatpush3.msra.mxu1 %v520_v13  ;;  %1994 = vmatpush3.msra.mxu0 %v487_v14  ;;  %v500_v25 = vld [vmem:[#allocation7 + $0xc8] sm:$0xff]  ;;  %v517_v26 = vld [vmem:[#allocation7 + $0x150] sm:$0xff]  ;;  %v499_v30 = vld [vmem:[#allocation7 + $0xc0] sm:$0xff]  ;;  %v2957_v47 = vsel %vm340_vm0, 1.0, %v2738_v46  ;;  %v2960_v48 = vsel %vm342_vm1, 1.0, %v2738_v46  ;;  %v2972_v59 = vsel %vm341_vm2, 1.0, %v2738_v46 }
  0x64   : > { %2034 = vmatprep.subr.mxu1 %v535_v15  ;;  %1995 = vmatprep.subr.mxu0 %v502_v16  ;;  %v484_v27 = vld [vmem:[#allocation7 + $0x48] sm:$0xff]  ;;  %v483_v33 = vld [vmem:[#allocation7 + $0x40] sm:$0xff]  ;;  %v498_v35 = vld [vmem:[#allocation7 + $0xb8] sm:$0xff]  ;;  %p2662_p7 = pnand %p2661_p5, %p3411_p11  ;;  %s2664_s16 = sshll.u32 %s2740_s0, 4  ;;  %s2665_s16 = int_to_ptr.vmem [resolvable:$false] %s2664_s16 }
  0x65   : > { %2035 = vmatpush3.msra.mxu1 %v519_v17  ;;  %1996 = vmatpush3.msra.mxu0 %v486_v18  ;;  %v532_v28 = vld [vmem:[#allocation7 + $0x1c8] sm:$0xff]  ;;  %v531_v34 = vld [vmem:[#allocation7 + $0x1c0] sm:$0xff]  ;;  %v482_v38 = vld [vmem:[#allocation7 + $0x38] sm:$0xff]  ;;  %s2666_s19 = scalar_lea.vmem %s2665_s16, 768  ;;  %p2667_p13 = scmp.lt.s32.totalorder %s3332_s22, %s2665_s16 }
  0x66   : > { %2036 = vmatprep.subr.mxu1 %v534_v19  ;;  %1997 = vmatprep.subr.mxu0 %v501_v21  ;;  %v516_v31 = vld [vmem:[#allocation7 + $0x148] sm:$0xff]  ;;  %v515_v36 = vld [vmem:[#allocation7 + $0x140] sm:$0xff]  ;;  %v530_v39 = vld [vmem:[#allocation7 + $0x1b8] sm:$0xff]  ;;  %p2663_p12 = pneg %p2662_p7  ;;  %p2668_p0 = scmp.lt.s32.totalorder %s2666_s19, %s2660_s12 }
  0x67   : > { %2037 = vmatpush3.msra.mxu1 %v518_v22  ;;  %1998 = vmatpush3.msra.mxu0 %v485_v23  ;;  %v497_v40 = vld [vmem:[#allocation7 + $0xb0] sm:$0xff]  ;;  %v514_v41 = vld [vmem:[#allocation7 + $0x138] sm:$0xff]  ;;  %v496_v44 = vld [vmem:[#allocation7 + $0xa8] sm:$0xff] }
  0x68   : > { %2038 = vmatprep.subr.mxu1 %v533_v24  ;;  %1999 = vmatprep.subr.mxu0 %v500_v25  ;;  %v481_v42 = vld [vmem:[#allocation7 + $0x30] sm:$0xff]  ;;  %v480_v49 = vld [vmem:[#allocation7 + $0x28] sm:$0xff]  ;;  %v495_v50 = vld [vmem:[#allocation7 + $0xa0] sm:$0xff]  ;;  %p2669_p10 = por %p2668_p0, %p2667_p13 }
  0x69   : > { %2039 = vmatpush3.msra.mxu1 %v517_v26  ;;  %2000 = vmatpush3.msra.mxu0 %v484_v27  ;;  %v529_v43 = vld [vmem:[#allocation7 + $0x1b0] sm:$0xff]  ;;  %v528_v51 = vld [vmem:[#allocation7 + $0x1a8] sm:$0xff]  ;;  %v334_v54 = vld [vmem:[%s2933_s24 + $0x10] sm:$0xff] }
  0x6a   : > { %2040 = vmatprep.subr.mxu1 %v532_v28  ;;  %2001 = vmatprep.subr.mxu0 %v499_v30  ;;  %v513_v45 = vld [vmem:[#allocation7 + $0x130] sm:$0xff]  ;;  %v512_v52 = vld [vmem:[#allocation7 + $0x128] sm:$0xff]  ;;  %v479_v55 = vld [vmem:[#allocation7 + $0x20] sm:$0xff]  ;;  %v2968_v58 = vmul.f32 %v2960_v48, %v334_v54  ;;  %p2670_p3 = pnand %p2669_p10, %p2663_p12 }
  0x6b   : > { %2041 = vmatpush3.msra.mxu1 %v516_v31  ;;  %2002 = vmatpush3.msra.mxu0 %v483_v33  ;;  %v332_v53 = vld [vmem:[%s2933_s24] sm:$0xff]  ;;  %v527_v56 = vld [vmem:[#allocation7 + $0x1a0] sm:$0xff]  ;;  %v494_v60 = vld [vmem:[#allocation7 + $0x98] sm:$0xff] }
  0x6c   : > { %2042 = vmatprep.subr.mxu1 %v531_v34  ;;  %2003 = vmatprep.subr.mxu0 %v498_v35  ;;  %v2965_v57 = vmul.f32 %v2957_v47, %v332_v53  ;;  %v511_v61 = vld [vmem:[#allocation7 + $0x120] sm:$0xff]  ;;  %v333_v62 = vld [vmem:[%s2933_s24 + $0x8] sm:$0xff]  ;;  %v384_v4 = vrot.slane %v2968_v58, 7  ;;  %v492_v8 = vld [vmem:[#allocation7 + $0x88] sm:$0xff]  ;;  %v359_v12 = vrot.slane %v2968_v58, 6  ;;  %v427_v30 = vrot.slane %v2968_v58, 1 }
  0x6d   : > { %2043 = vmatpush3.msra.mxu1 %v515_v36  ;;  %2004 = vmatpush3.msra.mxu0 %v482_v38  ;;  %v478_v63 = vld [vmem:[#allocation7 + $0x18] sm:$0xff]  ;;  %v493_v1 = vld [vmem:[#allocation7 + $0x90] sm:$0xff]  ;;  %v2978_v5 = vmul.f32 %v2972_v59, %v333_v62  ;;  %v476_v13 = vld [vmem:[#allocation7 + $0x8] sm:$0xff] }
  0x6e   : > { %2044 = vmatprep.subr.mxu1 %v530_v39  ;;  %2005 = vmatprep.subr.mxu0 %v497_v40  ;;  %v526_v0 = vld [vmem:[#allocation7 + $0x198] sm:$0xff]  ;;  %v382_v3 = vrot.slane %v2965_v57, 7  ;;  %v477_v6 = vld [vmem:[#allocation7 + $0x10] sm:$0xff]  ;;  %v357_v10 = vrot.slane %v2965_v57, 6  ;;  %v524_v14 = vld [vmem:[#allocation7 + $0x188] sm:$0xff]  ;;  %v425_v17 = vrot.slane %v2965_v57, 1 }
  0x6f   : > { %2045 = vmatpush3.msra.mxu1 %v514_v41  ;;  %2006 = vmatpush3.msra.mxu0 %v481_v42  ;;  %v510_v2 = vld [vmem:[#allocation7 + $0x118] sm:$0xff]  ;;  %v525_v7 = vld [vmem:[#allocation7 + $0x190] sm:$0xff]  ;;  %v491_v15 = vld [vmem:[#allocation7 + $0x80] sm:$0xff]  ;;  %v426_v18 = vrot.slane %v2978_v5, 1  ;;  %v383_v24 = vrot.slane %v2978_v5, 7  ;;  %v358_v26 = vrot.slane %v2978_v5, 6 }
  0x70   : > { %2046 = vmatprep.subr.mxu1 %v529_v43  ;;  %2007 = vmatprep.subr.mxu0 %v496_v44  ;;  %v509_v9 = vld [vmem:[#allocation7 + $0x110] sm:$0xff]  ;;  %v388_v16 = vsel %vm385_vm3, %v384_v4, %v382_v3  ;;  %v475_v19 = vld [vmem:[#allocation7] sm:$0xff]  ;;  %v508_v21 = vld [vmem:[#allocation7 + $0x108] sm:$0xff]  ;;  %v363_v22 = vsel %vm360_vm4, %v359_v12, %v357_v10  ;;  %v431_v40 = vsel %vm428_vm6, %v427_v30, %v425_v17  ;;  %v450_v53 = vrot.slane %v2965_v57, 2 }
  0x71   : > { %2047 = vmatpush3.msra.mxu1 %v513_v45  ;;  %2008 = vmatpush3.msra.mxu0 %v480_v49  ;;  %v523_v23 = vld [vmem:[#allocation7 + $0x180] sm:$0xff]  ;;  %v430_v27 = vsel %vm428_vm6, %v425_v17, %v426_v18  ;;  %v554_v28 = vld [vmem:[#allocation7 + $0x278] sm:$0xff]  ;;  %v553_v31 = vld [vmem:[#allocation7 + $0x270] sm:$0xff]  ;;  %v387_v32 = vsel %vm385_vm3, %v382_v3, %v383_v24  ;;  %v362_v33 = vsel %vm360_vm4, %v357_v10, %v358_v26  ;;  %v451_v54 = vrot.slane %v2978_v5, 2 }
  0x72   : > { %2048 = vmatprep.subr.mxu1 %v528_v51  ;;  %2009 = vmatprep.subr.mxu0 %v495_v50  ;;  %v507_v25 = vld [vmem:[#allocation7 + $0x100] sm:$0xff]  ;;  %v552_v34 = vld [vmem:[#allocation7 + $0x268] sm:$0xff]  ;;  %v429_v35 = vsel %vm428_vm6, %v426_v18, %v427_v30  ;;  %v386_v37 = vsel %vm385_vm3, %v383_v24, %v384_v4  ;;  %v361_v38 = vsel %vm360_vm4, %v358_v26, %v359_v12  ;;  %v550_v39 = vld [vmem:[#allocation7 + $0x258] sm:$0xff] }
  0x73   : > { %2049 = vmatpush3.msra.mxu1 %v512_v52  ;;  %2010 = vmatpush3.msra.mxu0 %v479_v55  ;;  %v551_v36 = vld [vmem:[#allocation7 + $0x260] sm:$0xff]  ;;  %v549_v41 = vld [vmem:[#allocation7 + $0x250] sm:$0xff]  ;;  %v548_v42 = vld [vmem:[#allocation7 + $0x248] sm:$0xff] }
  0x74   : > { %2050 = vmatprep.subr.mxu1 %v527_v56  ;;  %2011 = vmatprep.subr.mxu0 %v494_v60  ;;  %v547_v43 = vld [vmem:[#allocation7 + $0x240] sm:$0xff]  ;;  %v546_v44 = vld [vmem:[#allocation7 + $0x238] sm:$0xff]  ;;  %v545_v45 = vld [vmem:[#allocation7 + $0x230] sm:$0xff]  ;;  %v455_v60 = vsel %vm453_vm10, %v450_v53, %v451_v54 }
  0x75   : > { %2051 = vmatpush3.msra.mxu1 %v511_v61  ;;  %2012 = vmatpush3.msra.mxu0 %v478_v63  ;;  %v544_v49 = vld [vmem:[#allocation7 + $0x228] sm:$0xff]  ;;  %v543_v50 = vld [vmem:[#allocation7 + $0x220] sm:$0xff]  ;;  %v542_v51 = vld [vmem:[#allocation7 + $0x218] sm:$0xff]  ;;  %v452_v61 = vrot.slane %v2968_v58, 2 }
  0x76   : > { %2052 = vmatprep.subr.mxu1 %v526_v0  ;;  %2013 = vmatprep.subr.mxu0 %v493_v1  ;;  %v541_v52 = vld [vmem:[#allocation7 + $0x210] sm:$0xff]  ;;  %v540_v55 = vld [vmem:[#allocation7 + $0x208] sm:$0xff]  ;;  %v539_v56 = vld [vmem:[#allocation7 + $0x200] sm:$0xff] }
  0x77   : > { %2053 = vmatpush3.msra.mxu1 %v510_v2  ;;  %2014 = vmatpush3.msra.mxu0 %v477_v6  ;;  %v456_v62 = vsel %vm453_vm10, %v452_v61, %v450_v53  ;;  %v1956_v6 = vld [vmem:[%s3385_s3] ss:$0 sm:$0xff] }
  0x78   : > { %2054 = vmatprep.subr.mxu1 %v525_v7  ;;  %2015 = vmatprep.subr.mxu0 %v492_v8 }
  0x79   : > { %2055 = vmatpush3.msra.mxu1 %v509_v9  ;;  %2016 = vmatpush3.msra.mxu0 %v476_v13 }
  0x7a   : > { %2056 = vmatprep.subr.mxu1 %v524_v14  ;;  %2017 = vmatprep.subr.mxu0 %v491_v15 }
  0x7b   : > { %1957 = vmatprep.mubr.msk.f32.mxu0 %vm389_vm5, %v388_v16  ;;  %2018 = vmatpush3.msra.mxu0 %v475_v19 }
  0x7c   : > { %2057 = vmatpush3.msra.mxu1 %v508_v21  ;;  %1958 = vmatmul.mubr.msk.f32.vlgmr.msra.gmra.mxu0 %vm364_vm7, %v363_v22 }
  0x7d   : > { %2058 = vmatprep.subr.mxu1 %v523_v23  ;;  %2309 = vmatprep.subr.mxu0 %v2738_v46 }
  0x7e   : > { %2059 = vmatpush3.msra.mxu1 %v507_v25  ;;  %706 = vmatprep.mubr.f32.mxu1 %v430_v27 }
  0x7f   : > { %2310 = vmatpush3.msra.mxu0 %v554_v28  ;;  %707 = vmatmul.mubr.f32.vlgmr.msra.gmra.mxu1 %v2965_v57  ;;  %v454_v57 = vsel %vm453_vm10, %v451_v54, %v452_v61  ;;  %v967_v54 = vld [vmem:[#allocation7 + $0x478] sm:$0xff]  ;;  %v950_v61 = vld [vmem:[#allocation7 + $0x3f0] sm:$0xff] }
  0x80   : > { %2311 = vmatprep.subr.mxu0 %v2738_v46  ;;  %631 = vmatprep.mubr.f32.mxu0 %v387_v32 }
  0x81   : > { %2312 = vmatpush3.msra.mxu0 %v553_v31  ;;  %711 = vmatprep.mubr.f32.mxu1 %v429_v35  ;;  %v350_v35 = vand.u32 127, %v335_v11 }
  0x82   : > { %2313 = vmatprep.subr.mxu0 %v2738_v46  ;;  %632 = vmatmul.mubr.f32.gmra.mxu0 %v362_v33 }
  0x83   : > { %2314 = vmatpush3.msra.mxu0 %v552_v34  ;;  %712 = vmatmul.mubr.f32.gmra.mxu1 %v2978_v5  ;;  %vm351_vm12 = vcmp.lt.s32.totalorder %v350_v35, 48  ;;  %v910_v35 = vld [vmem:[#allocation7 + $0x2b0] sm:$0xff] }
  0x84   : > { %2315 = vmatprep.subr.mxu0 %v2738_v46  ;;  %636 = vmatprep.mubr.f32.mxu0 %v386_v37 }
  0x85   : > { %2316 = vmatpush3.msra.mxu0 %v551_v36  ;;  %1959 = vmatprep.mubr.msk.f32.mxu1 %vm437_vm8, %v431_v40 }
  0x86   : > { %2317 = vmatprep.subr.mxu0 %v2738_v46  ;;  %637 = vmatmul.mubr.f32.gmra.mxu0 %v361_v38  ;;  %v3064_v38 = vsel %vm351_vm12, 1.0, %v2738_v46 }
  0x87   : > { %2318 = vmatpush3.msra.mxu0 %v550_v39  ;;  %717 = vmatmul.mubr.f32.gmra.mxu1 %v2968_v58 }
  0x88   : > { %2319 = vmatprep.subr.mxu0 %v2738_v46  ;;  %2341 = vmatprep.mubr.msk.f32.mxu0 %vm2739_vm9, %v2738_v46 }
  0x89   : > { %2320 = vmatpush3.msra.mxu0 %v549_v41 }
  0x8a   : > { %2321 = vmatprep.subr.mxu0 %v2738_v46 }
  0x8b   : > { %2322 = vmatpush3.msra.mxu0 %v548_v42 }
  0x8c   : > { %2323 = vmatprep.subr.mxu0 %v2738_v46 }
  0x8d   : > { %2324 = vmatpush3.msra.mxu0 %v547_v43 }
  0x8e   : > { %2325 = vmatprep.subr.mxu0 %v2738_v46 }
  0x8f   : > { %2326 = vmatpush3.msra.mxu0 %v546_v44 }
  0x90   : > { %2327 = vmatprep.subr.mxu0 %v2738_v46 }
  0x91   : > { %2328 = vmatpush3.msra.mxu0 %v545_v45 }
  0x92   : > { %2329 = vmatprep.subr.mxu0 %v2738_v46 }
  0x93   : > { %2330 = vmatpush3.msra.mxu0 %v544_v49 }
  0x94   : > { %2331 = vmatprep.subr.mxu0 %v2738_v46 }
  0x95   : > { %2332 = vmatpush3.msra.mxu0 %v543_v50 }
  0x96   : > { %2333 = vmatprep.subr.mxu0 %v2738_v46 }
  0x97   : > { %2334 = vmatpush3.msra.mxu0 %v542_v51 }
  0x98   : > { %2335 = vmatprep.subr.mxu0 %v2738_v46 }
  0x99   : > { %2336 = vmatpush3.msra.mxu0 %v541_v52 }
  0x9a   : > { %2337 = vmatprep.subr.mxu0 %v2738_v46 }
  0x9b   : > { %2338 = vmatpush3.msra.mxu0 %v540_v55  ;;  %v951_v55 = vld [vmem:[#allocation7 + $0x3f8] sm:$0xff] }
  0x9c   : > { %2339 = vmatprep.subr.mxu0 %v2738_v46 }
  0x9d   : > { %2340 = vmatpush3.msra.mxu0 %v539_v56  ;;  %v966_v56 = vld [vmem:[#allocation7 + $0x470] sm:$0xff] }
  0x9e   : > { %2342 = vmatmul.mubr.f32.vlgmr.msra.gmra.mxu0 %v455_v60  ;;  %2129 = vmatprep.subr.mxu0 %v967_v54  ;;  %v935_v60 = vld [vmem:[#allocation7 + $0x378] sm:$0xff]  ;;  %v953_v54 = vld [vmem:[#allocation7 + $0x408] sm:$0xff] }
  0x9f   : > { %2344 = vmatprep.mubr.msk.f32.mxu0 %vm2739_vm9, %v2738_v46  ;;  %2130 = vmatpush3.msra.mxu0 %v951_v55  ;;  %v922_v55 = vld [vmem:[#allocation7 + $0x310] sm:$0xff] }
  0xa0   : > { %2131 = vmatprep.subr.mxu0 %v966_v56  ;;  %2088 = vmatprep.subr.mxu1 %v935_v60  ;;  %v937_v56 = vld [vmem:[#allocation7 + $0x388] sm:$0xff]  ;;  %v906_v60 = vld [vmem:[#allocation7 + $0x290] sm:$0xff] }
  0xa1   : > { %2132 = vmatpush3.msra.mxu0 %v950_v61  ;;  %v952_v61 = vld [vmem:[#allocation7 + $0x400] sm:$0xff] }
  0xa2   : > { %2345 = vmatmul.mubr.f32.gmra.mxu0 %v454_v57  ;;  %v919_v57 = vld [vmem:[#allocation7 + $0x2f8] sm:$0xff] }
  0xa3   : > { %2347 = vmatprep.mubr.msk.f32.mxu0 %vm2739_vm9, %v2738_v46  ;;  %2089 = vmatpush3.msra.mxu1 %v919_v57  ;;  %v921_v57 = vld [vmem:[#allocation7 + $0x308] sm:$0xff] }
  0xa6   : > { %2348 = vmatmul.mubr.msk.f32.gmra.mxu0 %vm462_vm11, %v456_v62  ;;  %v965_v62 = vld [vmem:[#allocation7 + $0x468] sm:$0xff] }
  0xa7   : > { %2133 = vmatprep.subr.mxu0 %v965_v62  ;;  %v936_v62 = vld [vmem:[#allocation7 + $0x380] sm:$0xff] }
 0x13c   : > { %v2019_v58 = vpop.f32.mrf.mxu0 }
 0x13e   : > { %v2020_v63 = vpop.f32.mrf.mxu0 }
 0x13f   : > { %v2060_v0 = vpop.f32.mrf.mxu1  ;;  %v2021_v5 = vadd.f32 %v2020_v63, %v2019_v58  ;;  %v934_v58 = vld [vmem:[#allocation7 + $0x370] sm:$0xff]  ;;  %v949_v63 = vld [vmem:[#allocation7 + $0x3e8] sm:$0xff] }
 0x140   : > { %2090 = vmatprep.subr.mxu1 %v934_v58  ;;  %2134 = vmatpush3.msra.mxu0 %v949_v63  ;;  %v905_v58 = vld [vmem:[#allocation7 + $0x288] sm:$0xff]  ;;  %v920_v63 = vld [vmem:[#allocation7 + $0x300] sm:$0xff] }
 0x141   : > { %v2061_v2 = vpop.f32.mrf.mxu1  ;;  %v629_v9 = vadd.f32 %v2021_v5, %v1956_v6  ;;  %v963_v5 = vld [vmem:[#allocation7 + $0x458] sm:$0xff] }
 0x142   : > { %v2022_v1 = vpop.f32.mrf.mxu0  ;;  %v2062_v10 = vadd.f32 %v2061_v2, %v2060_v0  ;;  %v918_v0 = vld [vmem:[#allocation7 + $0x2f0] sm:$0xff]  ;;  %v933_v2 = vld [vmem:[#allocation7 + $0x368] sm:$0xff] }
 0x143   : > { %v2063_v4 = vpop.f32.mrf.mxu1  ;;  %2091 = vmatpush3.msra.mxu1 %v918_v0  ;;  %v904_v0 = vld [vmem:[#allocation7 + $0x280] sm:$0xff] }
 0x144   : > { %v2023_v3 = vpop.f32.mrf.mxu0  ;;  %v709_v18 = vadd.f32 %v2062_v10, %v629_v9  ;;  %2092 = vmatprep.subr.mxu1 %v933_v2  ;;  %v962_v9 = vld [vmem:[#allocation7 + $0x450] sm:$0xff]  ;;  %v931_v10 = vld [vmem:[#allocation7 + $0x358] sm:$0xff] }
 0x145   : > { %v2064_v8 = vpop.f32.mrf.mxu1  ;;  %v2024_v12 = vadd.f32 %v2023_v3, %v2022_v1  ;;  %v964_v1 = vld [vmem:[#allocation7 + $0x460] sm:$0xff] }
 0x146   : > { %v2025_v7 = vpop.f32.mrf.mxu0  ;;  %v2065_v16 = vadd.f32 %v2064_v8, %v2063_v4  ;;  %2135 = vmatprep.subr.mxu0 %v964_v1  ;;  %v948_v3 = vld [vmem:[#allocation7 + $0x3e0] sm:$0xff]  ;;  %v917_v4 = vld [vmem:[#allocation7 + $0x2e8] sm:$0xff] }
 0x147   : > { %v2066_v14 = vpop.f32.mrf.mxu1  ;;  %v634_v15 = vadd.f32 %v2024_v12, %v1956_v6  ;;  %2136 = vmatpush3.msra.mxu0 %v948_v3  ;;  %2093 = vmatpush3.msra.mxu1 %v917_v4  ;;  %v916_v8 = vld [vmem:[#allocation7 + $0x2e0] sm:$0xff]  ;;  %v946_v12 = vld [vmem:[#allocation7 + $0x3d0] sm:$0xff] }
 0x148   : > { %v2026_v13 = vpop.f32.mrf.mxu0  ;;  %2137 = vmatprep.subr.mxu0 %v963_v5 }
 0x149   : > { %v2027_v17 = vadd.f32 %v2026_v13, %v2025_v7  ;;  %v2067_v19 = vpop.f32.mrf.mxu1  ;;  %v714_v26 = vadd.f32 %v2065_v16, %v634_v15  ;;  %v947_v7 = vld [vmem:[#allocation7 + $0x3d8] sm:$0xff]  ;;  %v930_v15 = vld [vmem:[#allocation7 + $0x350] sm:$0xff]  ;;  %v945_v16 = vld [vmem:[#allocation7 + $0x3c8] sm:$0xff] }
 0x14a   : > { %v2068_v25 = vadd.f32 %v2067_v19, %v2066_v14  ;;  %2138 = vmatpush3.msra.mxu0 %v947_v7  ;;  %v915_v13 = vld [vmem:[#allocation7 + $0x2d8] sm:$0xff]  ;;  %v961_v14 = vld [vmem:[#allocation7 + $0x448] sm:$0xff] }
 0x14b   : > { %v639_v24 = vadd.f32 %v2027_v17, %v1956_v6  ;;  %v932_v6 = vld [vmem:[#allocation7 + $0x360] sm:$0xff]  ;;  %2139 = vmatprep.subr.mxu0 %v962_v9  ;;  %v914_v17 = vld [vmem:[#allocation7 + $0x2d0] sm:$0xff]  ;;  %v929_v19 = vld [vmem:[#allocation7 + $0x348] sm:$0xff] }
 0x14c   : > { %2094 = vmatprep.subr.mxu1 %v932_v6  ;;  %2140 = vmatpush3.msra.mxu0 %v946_v12  ;;  %v1961_v12 = vld [vmem:[%s3386_s4] ss:$0 sm:$0xff] }
 0x14d   : > { %v719_v31 = vadd.f32 %v2068_v25, %v639_v24  ;;  %2095 = vmatpush3.msra.mxu1 %v916_v8  ;;  %2141 = vmatprep.subr.mxu0 %v961_v14  ;;  %v928_v24 = vld [vmem:[#allocation7 + $0x340] sm:$0xff]  ;;  %v943_v25 = vld [vmem:[#allocation7 + $0x3b8] sm:$0xff]  ;;  %v1962_v14 = vld [vmem:[%s3387_s5] ss:$0 sm:$0xff] }
 0x14e   : > { %2096 = vmatprep.subr.mxu1 %v931_v10  ;;  %2142 = vmatpush3.msra.mxu0 %v945_v16 }
 0x14f   : > { %2097 = vmatpush3.msra.mxu1 %v915_v13 }
 0x150   : > { %2098 = vmatprep.subr.mxu1 %v930_v15 }
 0x151   : > { %2099 = vmatpush3.msra.mxu1 %v914_v17 }
 0x152   : > { %2100 = vmatprep.subr.mxu1 %v929_v19 }
 0x15e   : > { %v788_v21 = vpop.f32.mrf.mxu0 }
 0x15f   : > { %v789_v22 = vadd.f32 %v788_v21, %v709_v18  ;;  %v960_v18 = vld [vmem:[#allocation7 + $0x440] sm:$0xff] }
 0x160   : > { %v2343_v23 = vpop.f32.mrf.mxu0  ;;  %2143 = vmatprep.subr.mxu0 %v960_v18  ;;  %v944_v21 = vld [vmem:[#allocation7 + $0x3c0] sm:$0xff] }
 0x161   : > { %802 = vadd.xlane.f32.xlu0 %v789_v22  ;;  %2144 = vmatpush3.msra.mxu0 %v944_v21  ;;  %v959_v23 = vld [vmem:[#allocation7 + $0x438] sm:$0xff] }
 0x162   : > { %v793_v27 = vpop.f32.mrf.mxu0  ;;  %2145 = vmatprep.subr.mxu0 %v959_v23 }
 0x163   : > { %v794_v28 = vadd.f32 %v793_v27, %v714_v26  ;;  %2146 = vmatpush3.msra.mxu0 %v943_v25  ;;  %v912_v26 = vld [vmem:[#allocation7 + $0x2c0] sm:$0xff]  ;;  %v958_v27 = vld [vmem:[#allocation7 + $0x430] sm:$0xff] }
 0x164   : > { %v2346_v30 = vpop.f32.mrf.mxu0  ;;  %2147 = vmatprep.subr.mxu0 %v958_v27 }
 0x165   : > { %804 = vadd.xlane.f32.xlu1 %v794_v28  ;;  %v942_v30 = vld [vmem:[#allocation7 + $0x3b0] sm:$0xff] }
 0x166   : > { %v798_v32 = vpop.f32.mrf.mxu0  ;;  %2148 = vmatpush3.msra.mxu0 %v942_v30 }
 0x167   : > { %v799_v33 = vadd.f32 %v798_v32, %v719_v31  ;;  %v911_v31 = vld [vmem:[#allocation7 + $0x2b8] sm:$0xff]  ;;  %v957_v32 = vld [vmem:[#allocation7 + $0x428] sm:$0xff] }
 0x168   : > { %v2349_v34 = vpop.f32.mrf.mxu0  ;;  %2149 = vmatprep.subr.mxu0 %v957_v32 }
 0x169   : > { %806 = vadd.xlane.f32.xlu0 %v799_v33  ;;  %v941_v34 = vld [vmem:[#allocation7 + $0x3a8] sm:$0xff] }
 0x16a   : > { %2150 = vmatpush3.msra.mxu0 %v941_v34 }
 0x1ea   : > { %v803_v36 = vpop.xlane.xlu0 %802 }
 0x1eb   : > { %v808_v37 = vmul.f32 0.020833334, %v803_v36  ;;  %v956_v36 = vld [vmem:[#allocation7 + $0x420] sm:$0xff] }
 0x1ec   : > { %2151 = vmatprep.subr.mxu0 %v956_v36 }
 0x1ed   : > { %v811_v39 = vsub.f32 %v789_v22, %v808_v37  ;;  %v913_v22 = vld [vmem:[#allocation7 + $0x2c8] sm:$0xff] }
 0x1ee   : > { %v805_v40 = vpop.xlane.xlu1 %804  ;;  %2101 = vmatpush3.msra.mxu1 %v913_v22  ;;  %v925_v37 = vld [vmem:[#allocation7 + $0x328] sm:$0xff] }
 0x1ef   : > { %v809_v41 = vmul.f32 0.020833334, %v805_v40  ;;  %v3067_v42 = vmul.f32 %v3064_v38, %v811_v39  ;;  %2102 = vmatprep.subr.mxu1 %v928_v24  ;;  %v940_v39 = vld [vmem:[#allocation7 + $0x3a0] sm:$0xff]  ;;  %v909_v40 = vld [vmem:[#allocation7 + $0x2a8] sm:$0xff] }
 0x1f0   : > { %2103 = vmatpush3.msra.mxu1 %v912_v26  ;;  %2152 = vmatpush3.msra.mxu0 %v940_v39 }
 0x1f1   : > { %v812_v43 = vsub.f32 %v794_v28, %v809_v41  ;;  %v817_v44 = vmul.f32 %v3067_v42, %v3067_v42  ;;  %v927_v28 = vld [vmem:[#allocation7 + $0x338] sm:$0xff] }
 0x1f2   : > { %v807_v45 = vpop.xlane.xlu0 %806  ;;  %2104 = vmatprep.subr.mxu1 %v927_v28  ;;  %v955_v41 = vld [vmem:[#allocation7 + $0x418] sm:$0xff] }
 0x1f3   : > { %v810_v49 = vmul.f32 0.020833334, %v807_v45  ;;  %820 = vadd.xlane.f32.xlu1 %v817_v44  ;;  %v3072_v11 = vmul.f32 %v3064_v38, %v812_v43  ;;  %2105 = vmatpush3.msra.mxu1 %v911_v31  ;;  %v924_v43 = vld [vmem:[#allocation7 + $0x320] sm:$0xff]  ;;  %v939_v44 = vld [vmem:[#allocation7 + $0x398] sm:$0xff] }
 0x1f4   : > { %2153 = vmatprep.subr.mxu0 %v955_v41  ;;  %v908_v45 = vld [vmem:[#allocation7 + $0x2a0] sm:$0xff] }
 0x1f5   : > { %v813_v50 = vsub.f32 %v799_v33, %v810_v49  ;;  %v818_v51 = vmul.f32 %v3072_v11, %v3072_v11  ;;  %v926_v33 = vld [vmem:[#allocation7 + $0x330] sm:$0xff]  ;;  %2154 = vmatpush3.msra.mxu0 %v939_v44  ;;  %v983_v44 = vld [vmem:[#allocation7 + $0x4f8] sm:$0xff] }
 0x1f6   : > { %2106 = vmatprep.subr.mxu1 %v926_v33  ;;  %v954_v49 = vld [vmem:[#allocation7 + $0x410] sm:$0xff] }
 0x1f7   : > { %822 = vadd.xlane.f32.xlu1 %v818_v51  ;;  %v3077_v52 = vmul.f32 %v3064_v38, %v813_v50  ;;  %2107 = vmatpush3.msra.mxu1 %v910_v35  ;;  %v923_v50 = vld [vmem:[#allocation7 + $0x318] sm:$0xff]  ;;  %v938_v51 = vld [vmem:[#allocation7 + $0x390] sm:$0xff] }
 0x1f8   : > { %2108 = vmatprep.subr.mxu1 %v925_v37  ;;  %2155 = vmatprep.subr.mxu0 %v954_v49 }
 0x1f9   : > { %v819_v53 = vmul.f32 %v3077_v52, %v3077_v52  ;;  %2109 = vmatpush3.msra.mxu1 %v909_v40  ;;  %2156 = vmatpush3.msra.mxu0 %v938_v51 }
 0x1fa   : > { %2110 = vmatprep.subr.mxu1 %v924_v43  ;;  %2157 = vmatprep.subr.mxu0 %v953_v54 }
 0x1fb   : > { %824 = vadd.xlane.f32.xlu0 %v819_v53  ;;  %2111 = vmatpush3.msra.mxu1 %v908_v45  ;;  %v907_v53 = vld [vmem:[#allocation7 + $0x298] sm:$0xff] }
 0x1fc   : > { %2112 = vmatprep.subr.mxu1 %v923_v50  ;;  %2158 = vmatpush3.msra.mxu0 %v937_v56  ;;  %v982_v50 = vld [vmem:[#allocation7 + $0x4f0] sm:$0xff] }
 0x1fd   : > { %2113 = vmatpush3.msra.mxu1 %v907_v53  ;;  %2159 = vmatprep.subr.mxu0 %v952_v61  ;;  %v981_v53 = vld [vmem:[#allocation7 + $0x4e8] sm:$0xff] }
 0x1fe   : > { %2114 = vmatprep.subr.mxu1 %v922_v55  ;;  %2160 = vmatpush3.msra.mxu0 %v936_v62  ;;  %v980_v55 = vld [vmem:[#allocation7 + $0x4e0] sm:$0xff]  ;;  %v977_v62 = vld [vmem:[#allocation7 + $0x4c8] sm:$0xff] }
 0x1ff   : > { %2115 = vmatpush3.msra.mxu1 %v906_v60  ;;  %v979_v60 = vld [vmem:[#allocation7 + $0x4d8] sm:$0xff] }
 0x200   : > { %2116 = vmatprep.subr.mxu1 %v921_v57  ;;  %v978_v57 = vld [vmem:[#allocation7 + $0x4d0] sm:$0xff] }
 0x201   : > { %2117 = vmatpush3.msra.mxu1 %v905_v58  ;;  %v976_v58 = vld [vmem:[#allocation7 + $0x4c0] sm:$0xff] }
 0x202   : > { %2118 = vmatprep.subr.mxu1 %v920_v63  ;;  %v975_v63 = vld [vmem:[#allocation7 + $0x4b8] sm:$0xff] }
 0x203   : > { %2119 = vmatpush3.msra.mxu1 %v904_v0  ;;  %v974_v0 = vld [vmem:[#allocation7 + $0x4b0] sm:$0xff] }
 0x204   : > { %2350 = vmatprep.subr.mxu1 %v2738_v46 }
 0x27c   : > { %v821_v1 = vpop.xlane.xlu1 %820 }
 0x27d   : > { %v826_v2 = vmul.f32 0.020833334, %v821_v1  ;;  %v973_v1 = vld [vmem:[#allocation7 + $0x4a8] sm:$0xff] }
 0x27f   : > { %v829_v3 = vadd.f32 1e-05, %v826_v2  ;;  %v972_v2 = vld [vmem:[#allocation7 + $0x4a0] sm:$0xff] }
 0x280   : > { %v823_v4 = vpop.xlane.xlu1 %822 }
 0x281   : > { %2551 = vrsqrt.f32 %v829_v3  ;;  %v827_v5 = vmul.f32 0.020833334, %v823_v4  ;;  %v971_v3 = vld [vmem:[#allocation7 + $0x498] sm:$0xff]  ;;  %v970_v4 = vld [vmem:[#allocation7 + $0x490] sm:$0xff] }
 0x283   : > { %v830_v6 = vadd.f32 1e-05, %v827_v5  ;;  %v969_v5 = vld [vmem:[#allocation7 + $0x488] sm:$0xff] }
 0x284   : > { %v825_v7 = vpop.xlane.xlu0 %824 }
 0x285   : > { %2553 = vrsqrt.f32 %v830_v6  ;;  %v828_v8 = vmul.f32 0.020833334, %v825_v7  ;;  %v968_v7 = vld [vmem:[#allocation7 + $0x480] sm:$0xff] }
 0x287   : > { %v831_v9 = vadd.f32 1e-05, %v828_v8 }
 0x289   : > { %2555 = vrsqrt.f32 %v831_v9 }
 0x28e   : > { %v2552_v10 = vpop.eup %2551 }
 0x28f   : > { %v835_v13 = vmul.f32 %v2552_v10, %v3067_v42 }
 0x291   : > { %v845_v15 = vmul.f32 %v1961_v12, %v835_v13 }
 0x292   : > { %v2554_v16 = vpop.eup %2553 }
 0x293   : > { %v855_v17 = vadd.f32 %v1962_v14, %v845_v15  ;;  %v836_v18 = vmul.f32 %v2554_v16, %v3072_v11 }
 0x295   : > { %v858_v19 = vmax.f32 %v855_v17, 0.0  ;;  %v846_v21 = vmul.f32 %v1961_v12, %v836_v18 }
 0x296   : > { %v2556_v22 = vpop.eup %2555 }
 0x297   : > { %v856_v23 = vadd.f32 %v1962_v14, %v846_v21  ;;  %v837_v24 = vmul.f32 %v2556_v22, %v3077_v52  ;;  %v3092_v27 = vmul.f32 %v2957_v47, %v858_v19 }
 0x299   : > { %v859_v25 = vmax.f32 %v856_v23, 0.0  ;;  %v847_v26 = vmul.f32 %v1961_v12, %v837_v24  ;;  %v885_v31 = vrot.slane %v3092_v27, 1  ;;  %v873_v52 = vrot.slane %v3092_v27, 7  ;;  %v1964_v23 = vld [vmem:[%s3385_s3 + $0x1] ss:$0 sm:$0xff] }
 0x29a   : > { %v864_v34 = vrot.slane %v3092_v27, 6  ;;  %v894_v8 = vrot.slane %v3092_v27, 2 }
 0x29b   : > { %v857_v42 = vadd.f32 %v1962_v14, %v847_v26  ;;  %v3095_v28 = vmul.f32 %v2972_v59, %v859_v25 }
 0x29d   : > { %v860_v30 = vmax.f32 %v857_v42, 0.0  ;;  %v886_v11 = vrot.slane %v3095_v28, 1  ;;  %v874_v39 = vrot.slane %v3095_v28, 7  ;;  %v865_v45 = vrot.slane %v3095_v28, 6 }
 0x29e   : > { %v895_v6 = vrot.slane %v3095_v28, 2 }
 0x29f   : > { %v889_v32 = vsel %vm428_vm6, %v885_v31, %v886_v11  ;;  %v3102_v33 = vmul.f32 %v2960_v48, %v860_v30  ;;  %v877_v49 = vsel %vm385_vm3, %v873_v52, %v874_v39  ;;  %v868_v54 = vsel %vm360_vm4, %v864_v34, %v865_v45 }
 0x2a0   : > { %1136 = vmatprep.mubr.f32.mxu0 %v889_v32  ;;  %v898_v9 = vsel %vm453_vm10, %v894_v8, %v895_v6 }
 0x2a1   : > { %1137 = vmatmul.mubr.f32.vlgmr.msra.gmra.mxu0 %v3092_v27  ;;  %v875_v35 = vrot.slane %v3102_v33, 7  ;;  %v887_v36 = vrot.slane %v3102_v33, 1  ;;  %v866_v37 = vrot.slane %v3102_v33, 6  ;;  %v896_v10 = vrot.slane %v3102_v33, 2 }
 0x2a3   : > { %v878_v40 = vsel %vm385_vm3, %v875_v35, %v873_v52  ;;  %v888_v41 = vsel %vm428_vm6, %v886_v11, %v887_v36  ;;  %v869_v43 = vsel %vm360_vm4, %v866_v37, %v864_v34  ;;  %v890_v51 = vsel %vm428_vm6, %v887_v36, %v885_v31 }
 0x2a4   : > { %1965 = vmatprep.mubr.msk.f32.mxu1 %vm389_vm5, %v878_v40  ;;  %1141 = vmatprep.mubr.f32.mxu0 %v888_v41  ;;  %v876_v56 = vsel %vm385_vm3, %v874_v39, %v875_v35  ;;  %v867_v61 = vsel %vm360_vm4, %v865_v45, %v866_v37  ;;  %v897_v12 = vsel %vm453_vm10, %v895_v6, %v896_v10  ;;  %v1383_v6 = vld [vmem:[#allocation7 + $0x678] sm:$0xff] }
 0x2a5   : > { %1966 = vmatmul.mubr.msk.f32.vlgmr.msra.gmra.mxu1 %vm364_vm7, %v869_v43  ;;  %1142 = vmatmul.mubr.f32.gmra.mxu0 %v3095_v28  ;;  %v899_v13 = vsel %vm453_vm10, %v896_v10, %v894_v8  ;;  %v1367_v8 = vld [vmem:[#allocation7 + $0x5f8] sm:$0xff] }
 0x2a6   : > { %2351 = vmatpush3.msra.mxu1 %v983_v44  ;;  %1061 = vmatprep.mubr.f32.mxu1 %v877_v49  ;;  %v1351_v10 = vld [vmem:[#allocation7 + $0x578] sm:$0xff] }
 0x2a7   : > { %1967 = vmatprep.mubr.msk.f32.mxu0 %vm437_vm8, %v890_v51  ;;  %2352 = vmatprep.subr.mxu1 %v2738_v46 }
 0x2a8   : > { %2353 = vmatpush3.msra.mxu1 %v982_v50  ;;  %2189 = vmatprep.subr.mxu0 %v1367_v8  ;;  %v1338_v8 = vld [vmem:[#allocation7 + $0x510] sm:$0xff] }
 0x2a9   : > { %2354 = vmatprep.subr.mxu1 %v2738_v46  ;;  %1062 = vmatmul.mubr.f32.gmra.mxu1 %v868_v54 }
 0x2aa   : > { %1147 = vmatmul.mubr.f32.gmra.mxu0 %v3102_v33  ;;  %2355 = vmatpush3.msra.mxu1 %v981_v53 }
 0x2ab   : > { %1066 = vmatprep.mubr.f32.mxu1 %v876_v56  ;;  %2356 = vmatprep.subr.mxu1 %v2738_v46 }
 0x2ac   : > { %2357 = vmatpush3.msra.mxu1 %v980_v55  ;;  %2190 = vmatpush3.msra.mxu0 %v1351_v10  ;;  %v1353_v10 = vld [vmem:[#allocation7 + $0x588] sm:$0xff] }
 0x2ad   : > { %2358 = vmatprep.subr.mxu1 %v2738_v46  ;;  %1067 = vmatmul.mubr.f32.gmra.mxu1 %v867_v61 }
 0x2ae   : > { %2359 = vmatpush3.msra.mxu1 %v979_v60  ;;  %2382 = vmatprep.mubr.msk.f32.mxu1 %vm2739_vm9, %v2738_v46 }
 0x2af   : > { %2360 = vmatprep.subr.mxu1 %v2738_v46 }
 0x2b0   : > { %2361 = vmatpush3.msra.mxu1 %v978_v57 }
 0x2b1   : > { %2362 = vmatprep.subr.mxu1 %v2738_v46 }
 0x2b2   : > { %2363 = vmatpush3.msra.mxu1 %v977_v62 }
 0x2b3   : > { %2364 = vmatprep.subr.mxu1 %v2738_v46 }
 0x2b4   : > { %2365 = vmatpush3.msra.mxu1 %v976_v58 }
 0x2b5   : > { %2366 = vmatprep.subr.mxu1 %v2738_v46 }
 0x2b6   : > { %2367 = vmatpush3.msra.mxu1 %v975_v63 }
 0x2b7   : > { %2368 = vmatprep.subr.mxu1 %v2738_v46 }
 0x2b8   : > { %2369 = vmatpush3.msra.mxu1 %v974_v0 }
 0x2b9   : > { %2370 = vmatprep.subr.mxu1 %v2738_v46 }
 0x2ba   : > { %2371 = vmatpush3.msra.mxu1 %v973_v1 }
 0x2bb   : > { %2372 = vmatprep.subr.mxu1 %v2738_v46 }
 0x2bc   : > { %2373 = vmatpush3.msra.mxu1 %v972_v2 }
 0x2bd   : > { %2374 = vmatprep.subr.mxu1 %v2738_v46 }
 0x2be   : > { %2375 = vmatpush3.msra.mxu1 %v971_v3 }
 0x2bf   : > { %2376 = vmatprep.subr.mxu1 %v2738_v46 }
 0x2c0   : > { %2377 = vmatpush3.msra.mxu1 %v970_v4 }
 0x2c1   : > { %2378 = vmatprep.subr.mxu1 %v2738_v46 }
 0x2c2   : > { %2379 = vmatpush3.msra.mxu1 %v969_v5  ;;  %v1399_v5 = vld [vmem:[#allocation7 + $0x6f8] sm:$0xff] }
 0x2c3   : > { %2380 = vmatprep.subr.mxu1 %v2738_v46 }
 0x2c4   : > { %2381 = vmatpush3.msra.mxu1 %v968_v7  ;;  %v1398_v7 = vld [vmem:[#allocation7 + $0x6f0] sm:$0xff] }
 0x2c5   : > { %2383 = vmatmul.mubr.f32.vlgmr.msra.gmra.mxu1 %v898_v9  ;;  %2230 = vmatprep.subr.mxu1 %v1399_v5  ;;  %v1382_v9 = vld [vmem:[#allocation7 + $0x670] sm:$0xff]  ;;  %v1385_v5 = vld [vmem:[#allocation7 + $0x688] sm:$0xff] }
 0x2c6   : > { %2385 = vmatprep.mubr.msk.f32.mxu1 %vm2739_vm9, %v2738_v46  ;;  %2231 = vmatpush3.msra.mxu1 %v1383_v6  ;;  %v1354_v6 = vld [vmem:[#allocation7 + $0x590] sm:$0xff] }
 0x2c7   : > { %2232 = vmatprep.subr.mxu1 %v1398_v7  ;;  %v1369_v7 = vld [vmem:[#allocation7 + $0x608] sm:$0xff] }
 0x2c8   : > { %2233 = vmatpush3.msra.mxu1 %v1382_v9  ;;  %v1384_v9 = vld [vmem:[#allocation7 + $0x680] sm:$0xff] }
 0x2c9   : > { %2386 = vmatmul.mubr.f32.gmra.mxu1 %v897_v12  ;;  %v1397_v12 = vld [vmem:[#allocation7 + $0x6e8] sm:$0xff] }
 0x2ca   : > { %2388 = vmatprep.mubr.msk.f32.mxu1 %vm2739_vm9, %v2738_v46  ;;  %2234 = vmatprep.subr.mxu1 %v1397_v12  ;;  %v1368_v12 = vld [vmem:[#allocation7 + $0x600] sm:$0xff] }
 0x2cd   : > { %2389 = vmatmul.mubr.msk.f32.gmra.mxu1 %vm462_vm11, %v899_v13  ;;  %v1366_v13 = vld [vmem:[#allocation7 + $0x5f0] sm:$0xff] }
 0x2ce   : > { %2191 = vmatprep.subr.mxu0 %v1366_v13  ;;  %v1337_v13 = vld [vmem:[#allocation7 + $0x508] sm:$0xff] }
 0x361   : > { %v2161_v16 = vpop.f32.mrf.mxu0 }
 0x363   : > { %v2162_v18 = vpop.f32.mrf.mxu0 }
 0x364   : > { %v2163_v28 = vadd.f32 %v2162_v18, %v2161_v16  ;;  %v1396_v16 = vld [vmem:[#allocation7 + $0x6e0] sm:$0xff] }
 0x365   : > { %v2120_v14 = vpop.f32.mrf.mxu1  ;;  %v2164_v21 = vpop.f32.mrf.mxu0  ;;  %v1380_v18 = vld [vmem:[#allocation7 + $0x660] sm:$0xff] }
 0x367   : > { %v2121_v15 = vpop.f32.mrf.mxu1  ;;  %v2165_v25 = vpop.f32.mrf.mxu0 }
 0x368   : > { %v2122_v22 = vadd.f32 %v2121_v15, %v2120_v14  ;;  %v2166_v52 = vadd.f32 %v2165_v25, %v2164_v21  ;;  %v1381_v14 = vld [vmem:[#allocation7 + $0x668] sm:$0xff]  ;;  %v1350_v15 = vld [vmem:[#allocation7 + $0x570] sm:$0xff]  ;;  %v1395_v21 = vld [vmem:[#allocation7 + $0x6d8] sm:$0xff] }
 0x369   : > { %v2123_v17 = vpop.f32.mrf.mxu1  ;;  %2235 = vmatpush3.msra.mxu1 %v1381_v14  ;;  %2192 = vmatpush3.msra.mxu0 %v1350_v15  ;;  %v1394_v25 = vld [vmem:[#allocation7 + $0x6d0] sm:$0xff]  ;;  %v1352_v14 = vld [vmem:[#allocation7 + $0x580] sm:$0xff] }
 0x36a   : > { %v1059_v26 = vadd.f32 %v2122_v22, %v1964_v23  ;;  %v2167_v30 = vpop.f32.mrf.mxu0  ;;  %2236 = vmatprep.subr.mxu1 %v1396_v16  ;;  %v1364_v22 = vld [vmem:[#allocation7 + $0x5e0] sm:$0xff] }
 0x36b   : > { %v2124_v19 = vpop.f32.mrf.mxu1  ;;  %2237 = vmatpush3.msra.mxu1 %v1380_v18  ;;  %v1336_v15 = vld [vmem:[#allocation7 + $0x500] sm:$0xff] }
 0x36c   : > { %v2125_v27 = vadd.f32 %v2124_v19, %v2123_v17  ;;  %v1139_v32 = vadd.f32 %v2163_v28, %v1059_v26  ;;  %v2168_v35 = vpop.f32.mrf.mxu0  ;;  %v1365_v17 = vld [vmem:[#allocation7 + $0x5e8] sm:$0xff]  ;;  %2238 = vmatprep.subr.mxu1 %v1395_v21  ;;  %v1363_v26 = vld [vmem:[#allocation7 + $0x5d8] sm:$0xff] }
 0x36d   : > { %v2126_v24 = vpop.f32.mrf.mxu1  ;;  %v2169_v41 = vadd.f32 %v2168_v35, %v2167_v30  ;;  %2193 = vmatprep.subr.mxu0 %v1365_v17  ;;  %v1349_v19 = vld [vmem:[#allocation7 + $0x568] sm:$0xff]  ;;  %v1362_v30 = vld [vmem:[#allocation7 + $0x5d0] sm:$0xff]  ;;  %v1391_v35 = vld [vmem:[#allocation7 + $0x6b8] sm:$0xff] }
 0x36e   : > { %v1064_v31 = vadd.f32 %v2125_v27, %v1964_v23  ;;  %2194 = vmatpush3.msra.mxu0 %v1349_v19  ;;  %v1378_v27 = vld [vmem:[#allocation7 + $0x650] sm:$0xff]  ;;  %v1393_v28 = vld [vmem:[#allocation7 + $0x6c8] sm:$0xff] }
 0x36f   : > { %v2127_v42 = vpop.f32.mrf.mxu1  ;;  %2195 = vmatprep.subr.mxu0 %v1364_v22 }
 0x370   : > { %v2128_v11 = vadd.f32 %v2127_v42, %v2126_v24  ;;  %v1144_v39 = vadd.f32 %v2166_v52, %v1064_v31  ;;  %v1348_v24 = vld [vmem:[#allocation7 + $0x560] sm:$0xff]  ;;  %v1347_v42 = vld [vmem:[#allocation7 + $0x558] sm:$0xff]  ;;  %v1377_v31 = vld [vmem:[#allocation7 + $0x648] sm:$0xff] }
 0x371   : > { %2196 = vmatpush3.msra.mxu0 %v1348_v24  ;;  %v1376_v52 = vld [vmem:[#allocation7 + $0x640] sm:$0xff] }
 0x372   : > { %v1069_v37 = vadd.f32 %v2128_v11, %v1964_v23  ;;  %v1379_v23 = vld [vmem:[#allocation7 + $0x658] sm:$0xff]  ;;  %2197 = vmatprep.subr.mxu0 %v1363_v26  ;;  %v1346_v11 = vld [vmem:[#allocation7 + $0x550] sm:$0xff] }
 0x373   : > { %2239 = vmatpush3.msra.mxu1 %v1379_v23  ;;  %2198 = vmatpush3.msra.mxu0 %v1347_v42 }
 0x374   : > { %v1149_v45 = vadd.f32 %v2169_v41, %v1069_v37  ;;  %2240 = vmatprep.subr.mxu1 %v1394_v25  ;;  %2199 = vmatprep.subr.mxu0 %v1362_v30  ;;  %v1375_v37 = vld [vmem:[#allocation7 + $0x638] sm:$0xff] }
 0x375   : > { %2241 = vmatpush3.msra.mxu1 %v1378_v27  ;;  %2200 = vmatpush3.msra.mxu0 %v1346_v11  ;;  %v1359_v41 = vld [vmem:[#allocation7 + $0x5b8] sm:$0xff]  ;;  %v1970_v27 = vld [vmem:[%s3386_s4 + $0x1] ss:$0 sm:$0xff] }
 0x376   : > { %2242 = vmatprep.subr.mxu1 %v1393_v28  ;;  %v1972_v28 = vld [vmem:[%s3387_s5 + $0x1] ss:$0 sm:$0xff] }
 0x377   : > { %2243 = vmatpush3.msra.mxu1 %v1377_v31 }
 0x385   : > { %v1218_v33 = vpop.f32.mrf.mxu1 }
 0x386   : > { %v1219_v34 = vadd.f32 %v1218_v33, %v1139_v32  ;;  %v1392_v32 = vld [vmem:[#allocation7 + $0x6c0] sm:$0xff]  ;;  %v1361_v33 = vld [vmem:[#allocation7 + $0x5c8] sm:$0xff] }
 0x387   : > { %v2384_v36 = vpop.f32.mrf.mxu1  ;;  %2244 = vmatprep.subr.mxu1 %v1392_v32  ;;  %2201 = vmatprep.subr.mxu0 %v1361_v33 }
 0x388   : > { %1232 = vadd.xlane.f32.xlu0 %v1219_v34  ;;  %2245 = vmatpush3.msra.mxu1 %v1376_v52  ;;  %v1360_v36 = vld [vmem:[#allocation7 + $0x5c0] sm:$0xff] }
 0x389   : > { %v1223_v40 = vpop.f32.mrf.mxu1  ;;  %2246 = vmatprep.subr.mxu1 %v1391_v35 }
 0x38a   : > { %v1224_v43 = vadd.f32 %v1223_v40, %v1144_v39  ;;  %2247 = vmatpush3.msra.mxu1 %v1375_v37  ;;  %v1344_v39 = vld [vmem:[#allocation7 + $0x540] sm:$0xff]  ;;  %v1390_v40 = vld [vmem:[#allocation7 + $0x6b0] sm:$0xff] }
 0x38b   : > { %v2387_v44 = vpop.f32.mrf.mxu1  ;;  %2248 = vmatprep.subr.mxu1 %v1390_v40 }
 0x38c   : > { %1234 = vadd.xlane.f32.xlu0 %v1224_v43  ;;  %v1343_v44 = vld [vmem:[#allocation7 + $0x538] sm:$0xff] }
 0x38d   : > { %v1228_v49 = vpop.f32.mrf.mxu1 }
 0x38e   : > { %v1229_v50 = vadd.f32 %v1228_v49, %v1149_v45  ;;  %v1389_v45 = vld [vmem:[#allocation7 + $0x6a8] sm:$0xff]  ;;  %v1358_v49 = vld [vmem:[#allocation7 + $0x5b0] sm:$0xff] }
 0x38f   : > { %v2390_v51 = vpop.f32.mrf.mxu1 }
 0x390   : > { %1236 = vadd.xlane.f32.xlu1 %v1229_v50  ;;  %v1342_v51 = vld [vmem:[#allocation7 + $0x530] sm:$0xff] }
 0x411   : > { %v1233_v53 = vpop.xlane.xlu0 %1232 }
 0x412   : > { %v1238_v54 = vmul.f32 0.020833334, %v1233_v53  ;;  %v1388_v53 = vld [vmem:[#allocation7 + $0x6a0] sm:$0xff] }
 0x414   : > { %v1241_v55 = vsub.f32 %v1219_v34, %v1238_v54  ;;  %v1345_v34 = vld [vmem:[#allocation7 + $0x548] sm:$0xff] }
 0x415   : > { %v1235_v56 = vpop.xlane.xlu0 %1234  ;;  %2202 = vmatpush3.msra.mxu0 %v1345_v34  ;;  %v1357_v54 = vld [vmem:[#allocation7 + $0x5a8] sm:$0xff] }
 0x416   : > { %v1239_v60 = vmul.f32 0.020833334, %v1235_v56  ;;  %v3172_v61 = vmul.f32 %v3064_v38, %v1241_v55  ;;  %2203 = vmatprep.subr.mxu0 %v1360_v36  ;;  %v1372_v55 = vld [vmem:[#allocation7 + $0x620] sm:$0xff]  ;;  %v1341_v56 = vld [vmem:[#allocation7 + $0x528] sm:$0xff] }
 0x417   : > { %2204 = vmatpush3.msra.mxu0 %v1344_v39 }
 0x418   : > { %v1242_v57 = vsub.f32 %v1224_v43, %v1239_v60  ;;  %v1247_v62 = vmul.f32 %v3172_v61, %v3172_v61  ;;  %v1374_v43 = vld [vmem:[#allocation7 + $0x630] sm:$0xff]  ;;  %2205 = vmatprep.subr.mxu0 %v1359_v41  ;;  %v1387_v60 = vld [vmem:[#allocation7 + $0x698] sm:$0xff] }
 0x419   : > { %v1237_v58 = vpop.xlane.xlu1 %1236  ;;  %2249 = vmatpush3.msra.mxu1 %v1374_v43  ;;  %2206 = vmatpush3.msra.mxu0 %v1343_v44 }
 0x41a   : > { %v1240_v63 = vmul.f32 0.020833334, %v1237_v58  ;;  %1250 = vadd.xlane.f32.xlu1 %v1247_v62  ;;  %v3177_v0 = vmul.f32 %v3064_v38, %v1242_v57  ;;  %2250 = vmatprep.subr.mxu1 %v1389_v45  ;;  %v1356_v57 = vld [vmem:[#allocation7 + $0x5a0] sm:$0xff]  ;;  %v1371_v62 = vld [vmem:[#allocation7 + $0x618] sm:$0xff] }
 0x41b   : > { %2207 = vmatprep.subr.mxu0 %v1358_v49  ;;  %v1340_v58 = vld [vmem:[#allocation7 + $0x520] sm:$0xff] }
 0x41c   : > { %v1243_v1 = vsub.f32 %v1229_v50, %v1240_v63  ;;  %v1248_v2 = vmul.f32 %v3177_v0, %v3177_v0  ;;  %v1373_v50 = vld [vmem:[#allocation7 + $0x628] sm:$0xff]  ;;  %2208 = vmatpush3.msra.mxu0 %v1342_v51  ;;  %v1386_v63 = vld [vmem:[#allocation7 + $0x690] sm:$0xff] }
 0x41d   : > { %2251 = vmatpush3.msra.mxu1 %v1373_v50  ;;  %2209 = vmatprep.subr.mxu0 %v1357_v54 }
 0x41e   : > { %1252 = vadd.xlane.f32.xlu1 %v1248_v2  ;;  %v3182_v3 = vmul.f32 %v3064_v38, %v1243_v1  ;;  %2252 = vmatprep.subr.mxu1 %v1388_v53  ;;  %v1355_v1 = vld [vmem:[#allocation7 + $0x598] sm:$0xff]  ;;  %v1370_v2 = vld [vmem:[#allocation7 + $0x610] sm:$0xff] }
 0x41f   : > { %2253 = vmatpush3.msra.mxu1 %v1372_v55  ;;  %2210 = vmatpush3.msra.mxu0 %v1341_v56 }
 0x420   : > { %v1249_v4 = vmul.f32 %v3182_v3, %v3182_v3  ;;  %2254 = vmatprep.subr.mxu1 %v1387_v60  ;;  %2211 = vmatprep.subr.mxu0 %v1356_v57 }
 0x421   : > { %2255 = vmatpush3.msra.mxu1 %v1371_v62  ;;  %2212 = vmatpush3.msra.mxu0 %v1340_v58  ;;  %v1415_v62 = vld [vmem:[#allocation7 + $0x778] sm:$0xff] }
 0x422   : > { %1254 = vadd.xlane.f32.xlu0 %v1249_v4  ;;  %2256 = vmatprep.subr.mxu1 %v1386_v63  ;;  %v1339_v4 = vld [vmem:[#allocation7 + $0x518] sm:$0xff] }
 0x423   : > { %2213 = vmatprep.subr.mxu0 %v1355_v1  ;;  %2257 = vmatpush3.msra.mxu1 %v1370_v2  ;;  %v1414_v1 = vld [vmem:[#allocation7 + $0x770] sm:$0xff] }
 0x424   : > { %2214 = vmatpush3.msra.mxu0 %v1339_v4  ;;  %2258 = vmatprep.subr.mxu1 %v1385_v5  ;;  %v1413_v4 = vld [vmem:[#allocation7 + $0x768] sm:$0xff] }
 0x425   : > { %2215 = vmatprep.subr.mxu0 %v1354_v6  ;;  %2259 = vmatpush3.msra.mxu1 %v1369_v7  ;;  %v1412_v6 = vld [vmem:[#allocation7 + $0x760] sm:$0xff] }
 0x426   : > { %2216 = vmatpush3.msra.mxu0 %v1338_v8  ;;  %2260 = vmatprep.subr.mxu1 %v1384_v9  ;;  %v1411_v8 = vld [vmem:[#allocation7 + $0x758] sm:$0xff] }
 0x427   : > { %2217 = vmatprep.subr.mxu0 %v1353_v10  ;;  %2261 = vmatpush3.msra.mxu1 %v1368_v12  ;;  %v1410_v10 = vld [vmem:[#allocation7 + $0x750] sm:$0xff]  ;;  %v1409_v12 = vld [vmem:[#allocation7 + $0x748] sm:$0xff] }
 0x428   : > { %2218 = vmatpush3.msra.mxu0 %v1337_v13  ;;  %2432 = vmatprep.subr.mxu1 %v2738_v46  ;;  %v1408_v13 = vld [vmem:[#allocation7 + $0x740] sm:$0xff] }
 0x429   : > { %2219 = vmatprep.subr.mxu0 %v1352_v14  ;;  %v1407_v14 = vld [vmem:[#allocation7 + $0x738] sm:$0xff] }
 0x42a   : > { %2220 = vmatpush3.msra.mxu0 %v1336_v15  ;;  %v1406_v15 = vld [vmem:[#allocation7 + $0x730] sm:$0xff] }
 0x42b   : > { %2391 = vmatprep.subr.mxu0 %v2738_v46 }
 0x4a3   : > { %v1251_v16 = vpop.xlane.xlu1 %1250 }
 0x4a4   : > { %v1256_v17 = vmul.f32 0.020833334, %v1251_v16  ;;  %v1405_v16 = vld [vmem:[#allocation7 + $0x728] sm:$0xff] }
 0x4a6   : > { %v1259_v18 = vadd.f32 1e-05, %v1256_v17  ;;  %v1404_v17 = vld [vmem:[#allocation7 + $0x720] sm:$0xff] }
 0x4a7   : > { %v1253_v19 = vpop.xlane.xlu1 %1252 }
 0x4a8   : > { %2557 = vrsqrt.f32 %v1259_v18  ;;  %v1257_v21 = vmul.f32 0.020833334, %v1253_v19  ;;  %v1403_v18 = vld [vmem:[#allocation7 + $0x718] sm:$0xff]  ;;  %v1402_v19 = vld [vmem:[#allocation7 + $0x710] sm:$0xff] }
 0x4aa   : > { %v1260_v22 = vadd.f32 1e-05, %v1257_v21  ;;  %v1401_v21 = vld [vmem:[#allocation7 + $0x708] sm:$0xff] }
 0x4ab   : > { %v1255_v23 = vpop.xlane.xlu0 %1254 }
 0x4ac   : > { %2559 = vrsqrt.f32 %v1260_v22  ;;  %v1258_v24 = vmul.f32 0.020833334, %v1255_v23  ;;  %v1400_v23 = vld [vmem:[#allocation7 + $0x700] sm:$0xff] }
 0x4ae   : > { %v1261_v25 = vadd.f32 1e-05, %v1258_v24 }
 0x4b0   : > { %2561 = vrsqrt.f32 %v1261_v25 }
 0x4b5   : > { %v2558_v26 = vpop.eup %2557 }
 0x4b6   : > { %v1265_v42 = vmul.f32 %v2558_v26, %v3172_v61 }
 0x4b8   : > { %v1276_v30 = vmul.f32 %v1970_v27, %v1265_v42 }
 0x4b9   : > { %v2560_v31 = vpop.eup %2559 }
 0x4ba   : > { %v1287_v11 = vadd.f32 %v1972_v28, %v1276_v30  ;;  %v1266_v32 = vmul.f32 %v2560_v31, %v3177_v0 }
 0x4bc   : > { %v1290_v33 = vmax.f32 %v1287_v11, 0.0  ;;  %v1277_v52 = vmul.f32 %v1970_v27, %v1266_v32 }
 0x4bd   : > { %v2562_v34 = vpop.eup %2561 }
 0x4be   : > { %v1288_v35 = vadd.f32 %v1972_v28, %v1277_v52  ;;  %v1267_v36 = vmul.f32 %v2562_v34, %v3182_v3  ;;  %v3198_v40 = vmul.f32 %v2957_v47, %v1290_v33 }
 0x4c0   : > { %v1291_v37 = vmax.f32 %v1288_v35, 0.0  ;;  %v1278_v39 = vmul.f32 %v1970_v27, %v1267_v36  ;;  %v1317_v44 = vrot.slane %v3198_v40, 1  ;;  %v1305_v3 = vrot.slane %v3198_v40, 7  ;;  %v1974_v35 = vld [vmem:[%s3385_s3 + $0x2] ss:$0 sm:$0xff] }
 0x4c1   : > { %v1296_v50 = vrot.slane %v3198_v40, 6  ;;  %v1326_v24 = vrot.slane %v3198_v40, 2 }
 0x4c2   : > { %v1289_v61 = vadd.f32 %v1972_v28, %v1278_v39  ;;  %v3201_v41 = vmul.f32 %v2972_v59, %v1291_v37 }
 0x4c4   : > { %v1292_v43 = vmax.f32 %v1289_v61, 0.0  ;;  %v1318_v0 = vrot.slane %v3201_v41, 1  ;;  %v1306_v55 = vrot.slane %v3201_v41, 7  ;;  %v1297_v58 = vrot.slane %v3201_v41, 6 }
 0x4c5   : > { %v1327_v22 = vrot.slane %v3201_v41, 2 }
 0x4c6   : > { %v1321_v45 = vsel %vm428_vm6, %v1317_v44, %v1318_v0  ;;  %v3208_v49 = vmul.f32 %v2960_v48, %v1292_v43  ;;  %v1309_v63 = vsel %vm385_vm3, %v1305_v3, %v1306_v55  ;;  %v1300_v5 = vsel %vm360_vm4, %v1296_v50, %v1297_v58 }
 0x4c7   : > { %1568 = vmatprep.mubr.f32.mxu1 %v1321_v45  ;;  %v1330_v25 = vsel %vm453_vm10, %v1326_v24, %v1327_v22 }
 0x4c8   : > { %1569 = vmatmul.mubr.f32.vlgmr.msra.gmra.mxu1 %v3198_v40  ;;  %v1307_v51 = vrot.slane %v3208_v49, 7  ;;  %v1319_v53 = vrot.slane %v3208_v49, 1  ;;  %v1298_v54 = vrot.slane %v3208_v49, 6  ;;  %v1328_v26 = vrot.slane %v3208_v49, 2 }
 0x4ca   : > { %v1310_v56 = vsel %vm385_vm3, %v1307_v51, %v1305_v3  ;;  %v1320_v60 = vsel %vm428_vm6, %v1318_v0, %v1319_v53  ;;  %v1301_v57 = vsel %vm360_vm4, %v1298_v54, %v1296_v50  ;;  %v1322_v2 = vsel %vm428_vm6, %v1319_v53, %v1317_v44 }
 0x4cb   : > { %1975 = vmatprep.mubr.msk.f32.mxu0 %vm389_vm5, %v1310_v56  ;;  %1573 = vmatprep.mubr.f32.mxu1 %v1320_v60  ;;  %v1308_v7 = vsel %vm385_vm3, %v1306_v55, %v1307_v51  ;;  %v1299_v9 = vsel %vm360_vm4, %v1297_v58, %v1298_v54  ;;  %v1329_v27 = vsel %vm453_vm10, %v1327_v22, %v1328_v26  ;;  %v1737_v22 = vld [vmem:[#allocation9 + $0x60] sm:$0xff] }
 0x4cc   : > { %1976 = vmatmul.mubr.msk.f32.vlgmr.msra.gmra.mxu0 %vm364_vm7, %v1301_v57  ;;  %1574 = vmatmul.mubr.f32.gmra.mxu1 %v3201_v41  ;;  %v1331_v42 = vsel %vm453_vm10, %v1328_v26, %v1326_v24  ;;  %v1735_v24 = vld [vmem:[#allocation9 + $0x50] sm:$0xff]  ;;  %v1732_v26 = vld [vmem:[#allocation9 + $0x38] sm:$0xff] }
 0x4cd   : > { %2392 = vmatpush3.msra.mxu0 %v1415_v62  ;;  %1493 = vmatprep.mubr.f32.mxu0 %v1309_v63 }
 0x4ce   : > { %1977 = vmatprep.mubr.msk.f32.mxu1 %vm437_vm8, %v1322_v2  ;;  %2393 = vmatprep.subr.mxu0 %v2738_v46  ;;  %v1739_v2 = vld [vmem:[#allocation9 + $0x70] sm:$0xff] }
 0x4cf   : > { %2394 = vmatpush3.msra.mxu0 %v1414_v1  ;;  %v1740_v1 = vld [vmem:[#allocation9 + $0x78] sm:$0xff] }
 0x4d0   : > { %2395 = vmatprep.subr.mxu0 %v2738_v46  ;;  %1494 = vmatmul.mubr.f32.gmra.mxu0 %v1300_v5 }
 0x4d1   : > { %1579 = vmatmul.mubr.f32.gmra.mxu1 %v3208_v49  ;;  %2396 = vmatpush3.msra.mxu0 %v1413_v4  ;;  %v1738_v4 = vld [vmem:[#allocation9 + $0x68] sm:$0xff] }
 0x4d2   : > { %1498 = vmatprep.mubr.f32.mxu0 %v1308_v7  ;;  %2397 = vmatprep.subr.mxu0 %v2738_v46 }
 0x4d3   : > { %2398 = vmatpush3.msra.mxu0 %v1412_v6  ;;  %2464 = vmatprep.mubr.msk.f32.mxu1 %vm2739_vm9, %v2738_v46 }
 0x4d4   : > { %2399 = vmatprep.subr.mxu0 %v2738_v46  ;;  %1499 = vmatmul.mubr.f32.gmra.mxu0 %v1299_v9 }
 0x4d5   : > { %2400 = vmatpush3.msra.mxu0 %v1411_v8  ;;  %2423 = vmatprep.mubr.msk.f32.mxu0 %vm2739_vm9, %v2738_v46 }
 0x4d6   : > { %2401 = vmatprep.subr.mxu0 %v2738_v46  ;;  %2433 = vmatpush3.msra.mxu1 %v1740_v1 }
 0x4d7   : > { %2402 = vmatpush3.msra.mxu0 %v1410_v10  ;;  %2434 = vmatprep.subr.mxu1 %v2738_v46 }
 0x4d8   : > { %2403 = vmatprep.subr.mxu0 %v2738_v46  ;;  %2435 = vmatpush3.msra.mxu1 %v1739_v2  ;;  %v2569_v2 = vld [vmem:[%s2933_s24] sm:$0xff] }
 0x4d9   : > { %2404 = vmatpush3.msra.mxu0 %v1409_v12  ;;  %2436 = vmatprep.subr.mxu1 %v2738_v46 }
 0x4da   : > { %2405 = vmatprep.subr.mxu0 %v2738_v46  ;;  %2437 = vmatpush3.msra.mxu1 %v1738_v4 }
 0x4db   : > { %2406 = vmatpush3.msra.mxu0 %v1408_v13  ;;  %2438 = vmatprep.subr.mxu1 %v2738_v46 }
 0x4dc   : > { %2407 = vmatprep.subr.mxu0 %v2738_v46  ;;  %2439 = vmatpush3.msra.mxu1 %v1737_v22 }
 0x4dd   : > { %2408 = vmatpush3.msra.mxu0 %v1407_v14  ;;  %2440 = vmatprep.subr.mxu1 %v2738_v46 }
 0x4de   : > { %2409 = vmatprep.subr.mxu0 %v2738_v46 }
 0x4df   : > { %2410 = vmatpush3.msra.mxu0 %v1406_v15 }
 0x4e0   : > { %2411 = vmatprep.subr.mxu0 %v2738_v46 }
 0x4e1   : > { %2412 = vmatpush3.msra.mxu0 %v1405_v16 }
 0x4e2   : > { %2413 = vmatprep.subr.mxu0 %v2738_v46 }
 0x4e3   : > { %2414 = vmatpush3.msra.mxu0 %v1404_v17 }
 0x4e4   : > { %2415 = vmatprep.subr.mxu0 %v2738_v46 }
 0x4e5   : > { %2416 = vmatpush3.msra.mxu0 %v1403_v18 }
 0x4e6   : > { %2417 = vmatprep.subr.mxu0 %v2738_v46 }
 0x4e7   : > { %2418 = vmatpush3.msra.mxu0 %v1402_v19 }
 0x4e8   : > { %2419 = vmatprep.subr.mxu0 %v2738_v46 }
 0x4e9   : > { %2420 = vmatpush3.msra.mxu0 %v1401_v21 }
 0x4ea   : > { %2421 = vmatprep.subr.mxu0 %v2738_v46 }
 0x4eb   : > { %2422 = vmatpush3.msra.mxu0 %v1400_v23  ;;  %v1736_v23 = vld [vmem:[#allocation9 + $0x58] sm:$0xff] }
 0x4ec   : > { %2424 = vmatmul.mubr.f32.vlgmr.msra.gmra.mxu0 %v1330_v25  ;;  %2441 = vmatpush3.msra.mxu1 %v1736_v23  ;;  %v1734_v25 = vld [vmem:[#allocation9 + $0x48] sm:$0xff] }
 0x4ed   : > { %2426 = vmatprep.mubr.msk.f32.mxu0 %vm2739_vm9, %v2738_v46  ;;  %2442 = vmatprep.subr.mxu1 %v2738_v46 }
 0x4ee   : > { %2443 = vmatpush3.msra.mxu1 %v1735_v24 }
 0x4ef   : > { %2444 = vmatprep.subr.mxu1 %v2738_v46 }
 0x4f0   : > { %2427 = vmatmul.mubr.f32.gmra.mxu0 %v1329_v27  ;;  %2445 = vmatpush3.msra.mxu1 %v1734_v25  ;;  %v1731_v27 = vld [vmem:[#allocation9 + $0x30] sm:$0xff] }
 0x4f1   : > { %2429 = vmatprep.mubr.msk.f32.mxu0 %vm2739_vm9, %v2738_v46  ;;  %2446 = vmatprep.subr.mxu1 %v2738_v46 }
 0x4f4   : > { %2430 = vmatmul.mubr.msk.f32.gmra.mxu0 %vm462_vm11, %v1331_v42  ;;  %v1730_v42 = vld [vmem:[#allocation9 + $0x28] sm:$0xff] }
 0x588   : > { %v2262_v31 = vpop.f32.mrf.mxu1 }
 0x58a   : > { %v2263_v32 = vpop.f32.mrf.mxu1 }
 0x58b   : > { %v2264_v61 = vadd.f32 %v2263_v32, %v2262_v31  ;;  %v1727_v31 = vld [vmem:[#allocation9 + $0x10] sm:$0xff]  ;;  %v1725_v32 = vld [vmem:[#allocation9] sm:$0xff] }
 0x58c   : > { %v2221_v28 = vpop.f32.mrf.mxu0  ;;  %v2265_v52 = vpop.f32.mrf.mxu1 }
 0x58e   : > { %v2222_v30 = vpop.f32.mrf.mxu0  ;;  %v2266_v37 = vpop.f32.mrf.mxu1 }
 0x58f   : > { %v2223_v34 = vadd.f32 %v2222_v30, %v2221_v28  ;;  %v2267_v45 = vadd.f32 %v2266_v37, %v2265_v52  ;;  %v1729_v28 = vld [vmem:[#allocation9 + $0x20] sm:$0xff]  ;;  %v1728_v30 = vld [vmem:[#allocation9 + $0x18] sm:$0xff] }
 0x590   : > { %v2224_v11 = vpop.f32.mrf.mxu0 }
 0x591   : > { %v1491_v39 = vadd.f32 %v2223_v34, %v1974_v35  ;;  %v2268_v29 = vpop.f32.mrf.mxu1 }
 0x592   : > { %v2225_v33 = vpop.f32.mrf.mxu0 }
 0x593   : > { %v2226_v20 = vadd.f32 %v2225_v33, %v2224_v11  ;;  %v1571_v44 = vadd.f32 %v2264_v61, %v1491_v39  ;;  %v2269_v3 = vpop.f32.mrf.mxu1  ;;  %v1726_v11 = vld [vmem:[#allocation9 + $0x8] sm:$0xff] }
 0x594   : > { %v2227_v36 = vpop.f32.mrf.mxu0  ;;  %v2270_v55 = vadd.f32 %v2269_v3, %v2268_v29  ;;  %v1980_v29 = vld [vmem:[%s3386_s4 + $0x2] ss:$0 sm:$0xff] }
 0x595   : > { %v1496_v41 = vadd.f32 %v2226_v20, %v1974_v35 }
 0x596   : > { %v2228_v40 = vpop.f32.mrf.mxu0 }
 0x597   : > { %v2229_v43 = vadd.f32 %v2228_v40, %v2227_v36  ;;  %v1576_v53 = vadd.f32 %v2267_v45, %v1496_v41 }
 0x599   : > { %v1501_v51 = vadd.f32 %v2229_v43, %v1974_v35  ;;  %v1982_v43 = vld [vmem:[%s3387_s5 + $0x2] ss:$0 sm:$0xff] }
 0x59b   : > { %v1581_v57 = vadd.f32 %v2270_v55, %v1501_v51 }
 0x5ac   : > { %v1650_v0 = vpop.f32.mrf.mxu0 }
 0x5ad   : > { %v1651_v49 = vadd.f32 %v1650_v0, %v1571_v44 }
 0x5ae   : > { %v2425_v50 = vpop.f32.mrf.mxu0 }
 0x5af   : > { %1664 = vadd.xlane.f32.xlu0 %v1651_v49 }
 0x5b0   : > { %v1655_v54 = vpop.f32.mrf.mxu0 }
 0x5b1   : > { %v1656_v56 = vadd.f32 %v1655_v54, %v1576_v53 }
 0x5b2   : > { %v2428_v60 = vpop.f32.mrf.mxu0 }
 0x5b3   : > { %1666 = vadd.xlane.f32.xlu1 %v1656_v56 }
 0x5b4   : > { %v1660_v62 = vpop.f32.mrf.mxu0 }
 0x5b5   : > { %v1661_v58 = vadd.f32 %v1660_v62, %v1581_v57  ;;  %v1983_v62 = vld [vmem:[%s3389_s7] ss:$0 sm:$0xff] }
 0x5b6   : > { %v2431_v63 = vpop.f32.mrf.mxu0 }
 0x5b7   : > { %1668 = vadd.xlane.f32.xlu0 %v1661_v58 }
 0x638   : > { %v1665_v5 = vpop.xlane.xlu0 %1664 }
 0x639   : > { %v1670_v6 = vmul.f32 0.020833334, %v1665_v5 }
 0x63b   : > { %v1673_v7 = vsub.f32 %v1651_v49, %v1670_v6 }
 0x63c   : > { %v1667_v8 = vpop.xlane.xlu1 %1666 }
 0x63d   : > { %v1671_v9 = vmul.f32 0.020833334, %v1667_v8  ;;  %v3283_v10 = vmul.f32 %v3064_v38, %v1673_v7 }
 0x63f   : > { %v1674_v12 = vsub.f32 %v1656_v56, %v1671_v9  ;;  %v1679_v13 = vmul.f32 %v3283_v10, %v3283_v10 }
 0x640   : > { %v1669_v14 = vpop.xlane.xlu0 %1668 }
 0x641   : > { %v1672_v15 = vmul.f32 0.020833334, %v1669_v14  ;;  %1682 = vadd.xlane.f32.xlu1 %v1679_v13  ;;  %v3288_v16 = vmul.f32 %v3064_v38, %v1674_v12 }
 0x643   : > { %v1675_v17 = vsub.f32 %v1661_v58, %v1672_v15  ;;  %v1680_v18 = vmul.f32 %v3288_v16, %v3288_v16 }
 0x645   : > { %1684 = vadd.xlane.f32.xlu0 %v1680_v18  ;;  %v3293_v19 = vmul.f32 %v3064_v38, %v1675_v17  ;;  %v1733_v38 = vld [vmem:[#allocation9 + $0x40] sm:$0xff] }
 0x646   : > { %2447 = vmatpush3.msra.mxu1 %v1733_v38 }
 0x647   : > { %v1681_v21 = vmul.f32 %v3293_v19, %v3293_v19  ;;  %2448 = vmatprep.subr.mxu1 %v2738_v46 }
 0x648   : > { %2449 = vmatpush3.msra.mxu1 %v1732_v26 }
 0x649   : > { %1686 = vadd.xlane.f32.xlu1 %v1681_v21  ;;  %2450 = vmatprep.subr.mxu1 %v2738_v46 }
 0x64a   : > { %2451 = vmatpush3.msra.mxu1 %v1731_v27 }
 0x64b   : > { %2452 = vmatprep.subr.mxu1 %v2738_v46 }
 0x64c   : > { %2453 = vmatpush3.msra.mxu1 %v1730_v42 }
 0x64d   : > { %2454 = vmatprep.subr.mxu1 %v2738_v46 }
 0x64e   : > { %2455 = vmatpush3.msra.mxu1 %v1729_v28 }
 0x64f   : > { %2456 = vmatprep.subr.mxu1 %v2738_v46 }
 0x650   : > { %2457 = vmatpush3.msra.mxu1 %v1728_v30 }
 0x651   : > { %2458 = vmatprep.subr.mxu1 %v2738_v46 }
 0x652   : > { %2459 = vmatpush3.msra.mxu1 %v1727_v31 }
 0x653   : > { %2460 = vmatprep.subr.mxu1 %v2738_v46 }
 0x654   : > { %2461 = vmatpush3.msra.mxu1 %v1726_v11 }
 0x655   : > { %2462 = vmatprep.subr.mxu1 %v2738_v46 }
 0x656   : > { %2463 = vmatpush3.msra.mxu1 %v1725_v32 }
 0x6ca   : > { %v1683_v33 = vpop.xlane.xlu1 %1682 }
 0x6cb   : > { %v1688_v52 = vmul.f32 0.020833334, %v1683_v33 }
 0x6cd   : > { %v1691_v34 = vadd.f32 1e-05, %v1688_v52 }
 0x6ce   : > { %v1685_v35 = vpop.xlane.xlu0 %1684 }
 0x6cf   : > { %2563 = vrsqrt.f32 %v1691_v34  ;;  %v1689_v36 = vmul.f32 0.020833334, %v1685_v35 }
 0x6d1   : > { %v1692_v37 = vadd.f32 1e-05, %v1689_v36 }
 0x6d2   : > { %v1687_v39 = vpop.xlane.xlu1 %1686 }
 0x6d3   : > { %2565 = vrsqrt.f32 %v1692_v37  ;;  %v1690_v20 = vmul.f32 0.020833334, %v1687_v39 }
 0x6d5   : > { %v1693_v40 = vadd.f32 1e-05, %v1690_v20 }
 0x6d7   : > { %2567 = vrsqrt.f32 %v1693_v40 }
 0x6dc   : > { %v2564_v61 = vpop.eup %2563 }
 0x6dd   : > { %v1697_v41 = vmul.f32 %v2564_v61, %v3283_v10 }
 0x6df   : > { %v1708_v44 = vmul.f32 %v1980_v29, %v1697_v41 }
 0x6e0   : > { %v2566_v0 = vpop.eup %2565 }
 0x6e1   : > { %v1719_v45 = vadd.f32 %v1982_v43, %v1708_v44  ;;  %v1698_v49 = vmul.f32 %v2566_v0, %v3288_v16 }
 0x6e3   : > { %v1722_v3 = vmax.f32 %v1719_v45, 0.0  ;;  %v1709_v50 = vmul.f32 %v1980_v29, %v1698_v49 }
 0x6e4   : > { %v2568_v51 = vpop.eup %2567 }
 0x6e5   : > { %2465 = vmatmul.mubr.f32.vlgmr.msra.gmra.mxu1 %v1722_v3  ;;  %v1720_v53 = vadd.f32 %v1982_v43, %v1709_v50  ;;  %v1699_v54 = vmul.f32 %v2568_v51, %v3293_v19 }
 0x6e6   : > { %2467 = vmatprep.mubr.msk.f32.mxu1 %vm2739_vm9, %v2738_v46 }
 0x6e7   : > { %v1723_v55 = vmax.f32 %v1720_v53, 0.0  ;;  %v1710_v56 = vmul.f32 %v1980_v29, %v1699_v54 }
 0x6e9   : > { %2468 = vmatmul.mubr.f32.gmra.mxu1 %v1723_v55  ;;  %v1721_v60 = vadd.f32 %v1982_v43, %v1710_v56 }
 0x6ea   : > { %2470 = vmatprep.mubr.msk.f32.mxu1 %vm2739_vm9, %v2738_v46  ;;  %v2570_v46 = vld [vmem:[%s2933_s24 + $0x8] sm:$0xff] }
 0x6eb   : > { %v1724_v57 = vmax.f32 %v1721_v60, 0.0 }
 0x6ed   : > { %2471 = vmatmul.mubr.f32.gmra.mxu1 %v1724_v57 }
 0x7a5   : > { %v1814_v58 = vpop.f32.mrf.mxu1 }
 0x7a6   : > { %v1815_v63 = vadd.f32 %v1983_v62, %v1814_v58 }
 0x7a7   : > { %v2466_v1 = vpop.f32.mrf.mxu1 }
 0x7a8   : > { %v1828_v4 = vadd.f32 %v2569_v2, %v1815_v63 }
 0x7a9   : > { %v1819_v5 = vpop.f32.mrf.mxu1 }
 0x7aa   : > { %v1831_v6 = vmul.f32 %v2957_v47, %v1828_v4  ;;  %v1820_v7 = vadd.f32 %v1983_v62, %v1819_v5  ;;  %v2571_v47 = vld [vmem:[%s2933_s24 + $0x10] sm:$0xff] }
 0x7ab   : > { %v2469_v8 = vpop.f32.mrf.mxu1 }
 0x7ac   : > { %1834 = vst [vmem:[%s330_s2] sm:$0xff] %v1831_v6  ;;  %v1829_v9 = vadd.f32 %v2570_v46, %v1820_v7 }
 0x7ad   : > { %v1824_v10 = vpop.f32.mrf.mxu1 }
 0x7ae   : > { %v1832_v12 = vmul.f32 %v2972_v59, %v1829_v9  ;;  %v1825_v13 = vadd.f32 %v1983_v62, %v1824_v10 }
 0x7af   : > { %v2472_v14 = vpop.f32.mrf.mxu1 }
 0x7b0   : > { %1835 = vst [vmem:[%s330_s2 + $0x8] sm:$0xff] %v1832_v12  ;;  %v1830_v15 = vadd.f32 %v2571_v47, %v1825_v13 }
 0x7b2   : > { %v1833_v16 = vmul.f32 %v2960_v48, %v1830_v15 }
 0x7b4   : > { %1836 = vst [vmem:[%s330_s2 + $0x10] sm:$0xff] %v1833_v16 }
 0x7b5   : > { %2673 = shalt.err (!%p2670_p3)
}
 0x7b6   : > { %s2674_s24 = scalar_lea.hbm %s3339_s15, 384  ;;  %s2678_s23 = scalar_lea.hbm %s3390_s8, 768 }
 0x7b7   : > { %p2675_p2 = scmp.ne.s32.totalorder %s3339_s15, %s2674_s24  ;;  %p2679_p4 = scmp.lt.s32.totalorder %s3339_s15, %s3390_s8 }
 0x7b8   : > { %p2680_p6 = scmp.lt.s32.totalorder %s2678_s23, %s2674_s24 }
 0x7b9   : > { %p2676_p9 = pnand %p2675_p2, %p3411_p11 }
 0x7ba   : > { %p2681_p8 = por %p2680_p6, %p2679_p4 }
 0x7bb   : > { %p2677_p1 = pneg %p2676_p9 }
 0x7bd   : > { %p2682_p5 = pnand %p2681_p8, %p2677_p1 }
 0x7bf   : > { %2685 = shalt.err (!%p2682_p5)
}
 0x7c0   : > { %s2741_s20 = smov 128   ;;  %s2742_s13 = smov 8  }
 0x7c1   : > { %2487 = dma.vmem_to_hbm [thread:$0]  (%p3411_p11), %s3332_s22, 384, %s3339_s15, %s1838_s27, %s2741_s20, %s2741_s20, %s2742_s13  }
 0x7c2 PF: > { %s1866_s12 = sand.u32 1, %s2718_s30   ;;  %p3412_p7 = scmp.ne.s32.totalorder %s3399_s14, 0 }
 0x7c3   : > { %p3413_p12 = scmp.ge.s32.totalorder %s2730_s11, 2  ;;  %s1867_s0 = scalar_lea.sflag [#allocation6], %s1866_s12 }
 0x7c5   : > { %p2501_p13 = pnand %p3413_p12, %p3412_p7 }
 0x7c7   : > { %p2502_p0 = pneg %p2501_p13 }
 0x7c9   : > { %2713 = dma.done.wait (%p2502_p0), %s1867_s0, 384  }
 0x7ca   : > { %2715 = vsyncadd (%p2502_p0), %s1867_s0, 4294966912  ;;  %p26_p10 = scmp.ge.s32.totalorder %s2869_s29, 4   ;;  %s3414_s30 = smov %s2722_s9 }
 0x7cb   : > { %s3415_s9 = smov %s2726_s10  ;;  %s3416_s10 = smov %s2885_s18 }
 0x7cc   : > { %s3417_s11 = smov %s2869_s29  ;;  %28 = sbr.rel (!%p26_p10) target bundleno = 12 (0xc), region = 109 }
 0x7d1   :  { %1872 = vsyncpa [#allocation5], 1 }
 0x7d2   :  { %1874 = vsyncpa [#allocation5 + $0x1], 1 }
 0x7d3   :  { %1875 = vsyncpa [#allocation8], 1 }
 0x7d4   :  { %1876 = vsyncpa [#allocation6], 1 }
 0x7d5   :  { %1878 = vsyncpa [#allocation6 + $0x1], 1 }

</bundles_post_ra>
